<compile_context>
chip_gen: v5e
topology: v5e:2x2
jax: 0.10.0
libtpu: 0.0.40
codegen_flags: <defaults>
</compile_context>

<pallas_src>
import jax
import jax.numpy as jnp
from jax.experimental import pallas as pl
from jax.experimental.pallas import tpu as pltpu

_LOG2 = 0.6931471805599453


def _round_up(a, b):
    return (a + b - 1) // b * b


# ----------------------------------------------------------------------------
# FF module math (3-layer ReLU MLP + linear shortcut), shortcut fused into the
# first matmul via W1s = concat([W1, Ws], axis=1). bf16 operands on the MXU,
# f32 accumulation and f32 elementwise (no bf16 VPU on v5e).
# ----------------------------------------------------------------------------
def _ff(x_bf16, w1s_ref, b1s_ref, w2_ref, b2_ref, w3_ref, b3_ref):
    d = x_bf16.shape[1]
    h1s = jnp.dot(x_bf16, w1s_ref[...], preferred_element_type=jnp.float32) + b1s_ref[...]
    # NOTE: the [:, :d] / [:, d:] split at lane d costs an XLU lane-shift; with
    # training_dim a multiple of 128 it would be lane-aligned (informational).
    h = jnp.maximum(h1s[:, :d], 0.0)   # block layer 1
    s = h1s[:, d:]                     # linear shortcut
    h = jnp.maximum(jnp.dot(h.astype(jnp.bfloat16), w2_ref[...],
                            preferred_element_type=jnp.float32) + b2_ref[...], 0.0)
    h = jnp.maximum(jnp.dot(h.astype(jnp.bfloat16), w3_ref[...],
                            preferred_element_type=jnp.float32) + b3_ref[...], 0.0)
    return h + s                       # f32


# ----------------------------------------------------------------------------
# Fused kernel: global_d FF (once per core) + local_d FF + JSD loss accumulation.
# Grid = (num_splits, row_tiles_per_split); outer axis is "parallel" (v7x megacore),
# inner axis accumulates into per-split resident output blocks.
# ----------------------------------------------------------------------------
def infograph_loss_kernel(x_ref, bid_ref, grep_ref,
                          lw1s_ref, lb1s_ref, lw2_ref, lb2_ref, lw3_ref, lb3_ref,
                          gw1s_ref, gb1s_ref, gw2_ref, gb2_ref, gw3_ref, gb3_ref,
                          epos_ref, eneg_ref, genc_ref):
    i = pl.program_id(1)                      # inner ("arbitrary") row-tile axis

    @pl.when(i == 0)
    def _init():
        epos_ref[...] = jnp.zeros(epos_ref.shape, epos_ref.dtype)
        eneg_ref[...] = jnp.zeros(eneg_ref.shape, eneg_ref.dtype)
        # global_d FF fused in: g_enc computed once (per core) into VMEM scratch.
        g = _ff(grep_ref[...], gw1s_ref, gb1s_ref, gw2_ref, gb2_ref, gw3_ref, gb3_ref)
        genc_ref[...] = g.astype(jnp.bfloat16)

    # ---- local_d FF on this row tile ----
    l_enc = _ff(x_ref[...], lw1s_ref, lb1s_ref, lw2_ref, lb2_ref, lw3_ref, lb3_ref)

    # ---- res = l_enc @ g_enc.T (contract last dims, no transpose materialized) ----
    res = jax.lax.dot_general(l_enc.astype(jnp.bfloat16), genc_ref[...],
                              (((1,), (1,)), ((), ())),
                              preferred_element_type=jnp.float32)       # [tile_n, G] f32

    # ---- pos/neg masks from int32 batch ids (-1 marks padded / out-of-range rows) ----
    bid = bid_ref[...]                                                   # [tile_n, 1]
    giota = jax.lax.broadcasted_iota(jnp.int32, res.shape, 1)
    pos = bid == giota
    neg = jnp.logical_and(bid >= 0, jnp.logical_not(pos))

    # ---- single softplus(-res) pass; masks applied after (masked entries = 0 exactly).
    # jnp.where is a select, so garbage rows of ragged / phantom tiles cannot leak. ----
    log2 = jnp.float32(_LOG2)
    sp = jnp.maximum(-res, 0.0) + jnp.log1p(jnp.exp(-jnp.abs(res)))      # softplus(-res)
    e_pos = jnp.where(pos, log2 - sp, 0.0)
    e_neg = jnp.where(neg, sp + res - log2, 0.0)

    # ---- per step: reduce only over the row-tile (sublane) axis; accumulate into the
    # resident output block. Final cross-lane reduce happens once in the wrapper. ----
    epos_ref[...] += jnp.sum(e_pos, axis=0, keepdims=True).reshape(epos_ref.shape)
    eneg_ref[...] += jnp.sum(e_neg, axis=0, keepdims=True).reshape(eneg_ref.shape)


def local_global_loss_fused(node_rep, batch, graph_rep, local_params, global_params,
                            num_graphs, tile_n=2048):
    n, d = node_rep.shape
    g = graph_rep.shape[0]

    x = node_rep.astype(jnp.bfloat16)          # halves HBM bytes of the hot stream
    if n >= 16:
        # No zero-padded copy of node_rep: tile_n is a multiple of 16 and <= n, so the
        # (only) ragged tile starts in bounds; its tail rows are killed by bid == -1.
        tile_n = max(16, min(_round_up(tile_n, 16), (n // 16) * 16))
        n_rows = n
    else:
        # Tiny inputs: pad to a single 16-row tile (negligible copy).
        tile_n = 16
        x = jnp.zeros((16, d), jnp.bfloat16).at[:n].set(x)
        n_rows = 16

    n_tiles = pl.cdiv(n_rows, tile_n)
    num_splits = 2 if n_tiles > 1 else 1       # v7x has 2 TCs; harmless (serial) on v5e/v6e
    tpc = pl.cdiv(n_tiles, num_splits)         # row tiles per split
    last_blk = n_tiles - 1

    # bid is tiny: pad it (not node_rep) so phantom / ragged rows read -1.
    bid = jnp.full((num_splits * tpc * tile_n, 1), -1, jnp.int32)
    bid = bid.at[:n, 0].set(batch.astype(jnp.int32))

    grep = graph_rep.astype(jnp.bfloat16)
    lw1s, lb1s, lw2, lb2, lw3, lb3 = local_params
    gw1s, gb1s, gw2, gb2, gw3, gb3 = global_params
    to_bf16 = lambda w: w.astype(jnp.bfloat16)

    def x_map(c, i):
        # Clamp phantom tiles (past the last real block) onto the last real block;
        # their bid rows are -1 so they contribute exactly zero.
        return (jnp.minimum(c * tpc + i, last_blk), 0)

    def bid_map(c, i):
        return (c * tpc + i, 0)

    def resident(a):
        return pl.BlockSpec(a.shape, lambda c, i, nd=a.ndim: (0,) * nd)

    x_spec = pl.BlockSpec((tile_n, d), x_map)
    bid_spec = pl.BlockSpec((tile_n, 1), bid_map)
    acc_spec = pl.BlockSpec((1, 1, g), lambda c, i: (c, 0, 0))

    # VMEM budget: double-buffered x blocks + lane-padded bid blocks + weights/headroom.
    vmem_est = 2 * (tile_n * d * 2 + tile_n * 128 * 4) + (4 << 20)
    vmem_limit = int(min(max(vmem_est, 16 << 20), 48 << 20))

    args = (x, bid, grep,
            to_bf16(lw1s), lb1s, to_bf16(lw2), lb2, to_bf16(lw3), lb3,
            to_bf16(gw1s), gb1s, to_bf16(gw2), gb2, to_bf16(gw3), gb3)

    epos, eneg = pl.pallas_call(
        infograph_loss_kernel,
        out_shape=(jax.ShapeDtypeStruct((num_splits, 1, g), jnp.float32),
                   jax.ShapeDtypeStruct((num_splits, 1, g), jnp.float32)),
        grid=(num_splits, tpc),
        in_specs=[x_spec, bid_spec] + [resident(a) for a in args[2:]],
        out_specs=(acc_spec, acc_spec),
        scratch_shapes=[pltpu.VMEM((g, d), jnp.bfloat16)],   # g_enc cache
        compiler_params=pltpu.CompilerParams(
            dimension_semantics=("parallel", "arbitrary"),
            vmem_limit_bytes=vmem_limit),
    )(*args)

    e_pos = jnp.sum(epos) / n
    # NOTE: num_graphs == 1 divides by zero, exactly as in the PyTorch reference.
    e_neg = jnp.sum(eneg) / (n * (num_graphs - 1))
    return e_neg - e_pos


# ----------------------------------------------------------------------------
# Parameter init (xavier_uniform weights, zero biases; shortcut pre-fused)
# ----------------------------------------------------------------------------
def xavier_uniform(key, fan_in, fan_out):
    bound = (6.0 / (fan_in + fan_out)) ** 0.5
    return jax.random.uniform(key, (fan_in, fan_out), jnp.float32, -bound, bound)


def init_ff_params(key, dim):
    ks = jax.random.split(key, 4)
    w1 = xavier_uniform(ks[0], dim, dim)
    w2 = xavier_uniform(ks[1], dim, dim)
    w3 = xavier_uniform(ks[2], dim, dim)
    ws = xavier_uniform(ks[3], dim, dim)
    w1s = jnp.concatenate([w1, ws], axis=1)              # fused [block | shortcut]
    return (w1s, jnp.zeros((1, 2 * dim), jnp.float32),
            w2, jnp.zeros((1, dim), jnp.float32),
            w3, jnp.zeros((1, dim), jnp.float32))


# ----------------------------------------------------------------------------
# InfoGraph forward (prior=False branch -> PRIOR = 0)
# ----------------------------------------------------------------------------
def infograph_forward(x, edge_index, edge_attr, batch, params, num_graphs,
                      tile_n=2048):
    # TODO(synk): external GNN encoder replaced by linear+tanh + global mean pool.
    node_rep = jnp.tanh(x @ params["enc_w"])                        # [N, D]
    one_hot = jax.nn.one_hot(batch, num_graphs, dtype=jnp.float32)  # [N, G]
    counts = jnp.maximum(one_hot.sum(axis=0), 1.0)
    graph_rep = (one_hot.T @ node_rep) / counts[:, None]            # [G, D]

    loss = local_global_loss_fused(node_rep, batch, graph_rep,
                                   params["local_d"], params["global_d"],
                                   num_graphs, tile_n=tile_n)

    PRIOR = 0.0  # args.prior = False (prior=True branch references undefined self.gamma)
    return loss + PRIOR


# ----------------------------------------------------------------------------
# Pure-JAX f32 reference (mirrors the PyTorch math, masking BEFORE softplus)
# ----------------------------------------------------------------------------
def _ref_forward(x, batch, params, num_graphs):
    num_nodes = x.shape[0]
    node_rep = jnp.tanh(x @ params["enc_w"])
    one_hot = jax.nn.one_hot(batch, num_graphs, dtype=jnp.float32)
    counts = jnp.maximum(one_hot.sum(axis=0), 1.0)
    graph_rep = (one_hot.T @ node_rep) / counts[:, None]

    def ff(a, p):
        w1s, b1s, w2, b2, w3, b3 = p
        d = a.shape[1]
        h1s = a @ w1s + b1s
        h = jax.nn.relu(h1s[:, :d])
        s = h1s[:, d:]
        h = jax.nn.relu(h @ w2 + b2)
        h = jax.nn.relu(h @ w3 + b3)
        return h + s

    g_enc = ff(graph_rep, params["global_d"])
    l_enc = ff(node_rep, params["local_d"])
    res = l_enc @ g_enc.T
    pos = one_hot
    neg = 1.0 - pos
    log2 = jnp.log(2.0)
    e_pos = (log2 - jax.nn.softplus(-(res * pos))).sum() / num_nodes
    e_neg = ((jax.nn.softplus(-(res * neg)) + res * neg - log2).sum()
             / (num_nodes * (num_graphs - 1)))
    return e_neg - e_pos


if __name__ == "__main__":
    # Shapes consistent with the module: emb_dim=16, layer=2 -> training_dim=32
    emb_dim, layer = 16, 2
    training_dim = emb_dim * layer
    num_nodes, num_graphs, feat_dim = 200, 5, 8

    key = jax.random.PRNGKey(0)
    k_x, k_enc, k_loc, k_glob = jax.random.split(key, 4)

    x = jax.random.normal(k_x, (num_nodes, feat_dim), jnp.float32)
    batch = jnp.repeat(jnp.arange(num_graphs, dtype=jnp.int32),
                       num_nodes // num_graphs)
    # edge_index / edge_attr are only consumed by the external encoder; dummies.
    edge_index = jnp.zeros((2, num_nodes), jnp.int32)
    edge_attr = jnp.zeros((num_nodes, 2), jnp.float32)

    params = {
        "enc_w": xavier_uniform(k_enc, feat_dim, training_dim),
        "local_d": init_ff_params(k_loc, training_dim),
        "global_d": init_ff_params(k_glob, training_dim),
    }

    ref = _ref_forward(x, batch, params, num_graphs)

    # Config A: default tile (clamped to the input) -> 2 row tiles, one per TC on v7x.
    loss_a = jax.block_until_ready(
        infograph_forward(x, edge_index, edge_attr, batch, params, num_graphs))
    # Config B: small tile -> multi-step accumulation + ragged tail + phantom tile.
    loss_b = jax.block_until_ready(
        infograph_forward(x, edge_index, edge_attr, batch, params, num_graphs,
                          tile_n=48))

    for loss in (loss_a, loss_b):
        assert jnp.isfinite(loss)
        assert abs(float(loss) - float(ref)) < 5e-2 * max(1.0, abs(float(ref))), \
            (float(loss), float(ref))
    print("KERNEL_OK")
</pallas_src>

<mosaic_0001>
module attributes {stable_mosaic.version = 11 : i64} {
  func.func @infograph_loss_kernel(%arg0: i32, %arg1: i32, %arg2: memref<192x32xbf16, #tpu.memory_space<vmem>>, %arg3: memref<192x1xi32, #tpu.memory_space<vmem>>, %arg4: memref<5x32xbf16, #tpu.memory_space<vmem>>, %arg5: memref<32x64xbf16, #tpu.memory_space<vmem>>, %arg6: memref<1x64xf32, #tpu.memory_space<vmem>>, %arg7: memref<32x32xbf16, #tpu.memory_space<vmem>>, %arg8: memref<1x32xf32, #tpu.memory_space<vmem>>, %arg9: memref<32x32xbf16, #tpu.memory_space<vmem>>, %arg10: memref<1x32xf32, #tpu.memory_space<vmem>>, %arg11: memref<32x64xbf16, #tpu.memory_space<vmem>>, %arg12: memref<1x64xf32, #tpu.memory_space<vmem>>, %arg13: memref<32x32xbf16, #tpu.memory_space<vmem>>, %arg14: memref<1x32xf32, #tpu.memory_space<vmem>>, %arg15: memref<32x32xbf16, #tpu.memory_space<vmem>>, %arg16: memref<1x32xf32, #tpu.memory_space<vmem>>, %arg17: memref<1x1x5xf32, #tpu.memory_space<vmem>>, %arg18: memref<1x1x5xf32, #tpu.memory_space<vmem>>, %arg19: memref<5x32xbf16, #tpu.memory_space<vmem>>) attributes {dimension_semantics = [#tpu.dimension_semantics<parallel>, #tpu.dimension_semantics<arbitrary>], iteration_bounds = array<i64: 2, 1>, scalar_prefetch = 0 : i64, scratch_operands = 1 : i64, tpu.core_type = #tpu.core_type<tc>, window_params = [{transform_indices = @transform_0, window_bounds = array<i64: 192, 32>}, {transform_indices = @transform_1, window_bounds = array<i64: 192, 1>}, {pipeline_mode = #tpu.pipeline_mode<synchronous>, transform_indices = @transform_2, window_bounds = array<i64: 5, 32>}, {pipeline_mode = #tpu.pipeline_mode<synchronous>, transform_indices = @transform_3, window_bounds = array<i64: 32, 64>}, {pipeline_mode = #tpu.pipeline_mode<synchronous>, transform_indices = @transform_4, window_bounds = array<i64: 1, 64>}, {pipeline_mode = #tpu.pipeline_mode<synchronous>, transform_indices = @transform_5, window_bounds = array<i64: 32, 32>}, {pipeline_mode = #tpu.pipeline_mode<synchronous>, transform_indices = @transform_6, window_bounds = array<i64: 1, 32>}, {pipeline_mode = #tpu.pipeline_mode<synchronous>, transform_indices = @transform_7, window_bounds = array<i64: 32, 32>}, {pipeline_mode = #tpu.pipeline_mode<synchronous>, transform_indices = @transform_8, window_bounds = array<i64: 1, 32>}, {pipeline_mode = #tpu.pipeline_mode<synchronous>, transform_indices = @transform_9, window_bounds = array<i64: 32, 64>}, {pipeline_mode = #tpu.pipeline_mode<synchronous>, transform_indices = @transform_10, window_bounds = array<i64: 1, 64>}, {pipeline_mode = #tpu.pipeline_mode<synchronous>, transform_indices = @transform_11, window_bounds = array<i64: 32, 32>}, {pipeline_mode = #tpu.pipeline_mode<synchronous>, transform_indices = @transform_12, window_bounds = array<i64: 1, 32>}, {pipeline_mode = #tpu.pipeline_mode<synchronous>, transform_indices = @transform_13, window_bounds = array<i64: 32, 32>}, {pipeline_mode = #tpu.pipeline_mode<synchronous>, transform_indices = @transform_14, window_bounds = array<i64: 1, 32>}, {transform_indices = @transform_15, window_bounds = array<i64: 1, 1, 5>}, {transform_indices = @transform_16, window_bounds = array<i64: 1, 1, 5>}]} {
    %c0_i32 = arith.constant 0 : i32
    %0 = arith.cmpi eq, %arg1, %c0_i32 : i32
    %1 = arith.extui %0 : i1 to i32
    %c0_i32_0 = arith.constant 0 : i32
    %2 = arith.cmpi ne, %1, %c0_i32_0 : i32
    scf.if %2 {
      %cst_47 = arith.constant 0.000000e+00 : f32
      %73 = vector.broadcast %cst_47 : f32 to vector<1x1x5xf32>
      %c0_48 = arith.constant 0 : index
      %c0_49 = arith.constant 0 : index
      %c0_50 = arith.constant 0 : index
      %74 = vector.load %arg17[%c0_48, %c0_49, %c0_50] : memref<1x1x5xf32, #tpu.memory_space<vmem>>, vector<1x1x5xf32>
      tpu.vector_store %arg17[%c0_48, %c0_49, %c0_50], %73 {strides = array<i32>} : memref<1x1x5xf32, #tpu.memory_space<vmem>>, vector<1x1x5xf32>,
      %cst_51 = arith.constant 0.000000e+00 : f32
      %75 = vector.broadcast %cst_51 : f32 to vector<1x1x5xf32>
      %c0_52 = arith.constant 0 : index
      %c0_53 = arith.constant 0 : index
      %c0_54 = arith.constant 0 : index
      %76 = vector.load %arg18[%c0_52, %c0_53, %c0_54] : memref<1x1x5xf32, #tpu.memory_space<vmem>>, vector<1x1x5xf32>
      tpu.vector_store %arg18[%c0_52, %c0_53, %c0_54], %75 {strides = array<i32>} : memref<1x1x5xf32, #tpu.memory_space<vmem>>, vector<1x1x5xf32>,
      %c0_55 = arith.constant 0 : index
      %c0_56 = arith.constant 0 : index
      %77 = vector.load %arg4[%c0_55, %c0_56] : memref<5x32xbf16, #tpu.memory_space<vmem>>, vector<5x32xbf16>
      %c0_57 = arith.constant 0 : index
      %c0_58 = arith.constant 0 : index
      %78 = vector.load %arg11[%c0_57, %c0_58] : memref<32x64xbf16, #tpu.memory_space<vmem>>, vector<32x64xbf16>
      %cst_59 = arith.constant dense<0.000000e+00> : vector<5x64xf32>
      %79 = tpu.matmul %77, %78, %cst_59 {dimension_numbers = #tpu.dot_dimension_numbers<[1], [0], [0], [1], [0, 0, 1, 1], [], []>} : vector<5x32xbf16>, vector<32x64xbf16>, vector<5x64xf32> -> vector<5x64xf32>
      %c0_60 = arith.constant 0 : index
      %c0_61 = arith.constant 0 : index
      %80 = vector.load %arg12[%c0_60, %c0_61] : memref<1x64xf32, #tpu.memory_space<vmem>>, vector<1x64xf32>
      %81 = vector.broadcast %80 : vector<1x64xf32> to vector<5x64xf32>
      %82 = arith.addf %79, %81 : vector<5x64xf32>
      %83 = vector.extract_strided_slice %82 {offsets = [0, 0], sizes = [5, 32], strides = [1, 1]} : vector<5x64xf32> to vector<5x32xf32>
      %cst_62 = arith.constant 0.000000e+00 : f32
      %84 = vector.broadcast %cst_62 : f32 to vector<5x32xf32>
      %85 = arith.maximumf %83, %84 : vector<5x32xf32>
      %86 = vector.extract_strided_slice %82 {offsets = [0, 32], sizes = [5, 32], strides = [1, 1]} : vector<5x64xf32> to vector<5x32xf32>
      %87 = arith.truncf %85 : vector<5x32xf32> to vector<5x32xbf16>
      %c0_63 = arith.constant 0 : index
      %c0_64 = arith.constant 0 : index
      %88 = vector.load %arg13[%c0_63, %c0_64] : memref<32x32xbf16, #tpu.memory_space<vmem>>, vector<32x32xbf16>
      %cst_65 = arith.constant dense<0.000000e+00> : vector<5x32xf32>
      %89 = tpu.matmul %87, %88, %cst_65 {dimension_numbers = #tpu.dot_dimension_numbers<[1], [0], [0], [1], [0, 0, 1, 1], [], []>} : vector<5x32xbf16>, vector<32x32xbf16>, vector<5x32xf32> -> vector<5x32xf32>
      %c0_66 = arith.constant 0 : index
      %c0_67 = arith.constant 0 : index
      %90 = vector.load %arg14[%c0_66, %c0_67] : memref<1x32xf32, #tpu.memory_space<vmem>>, vector<1x32xf32>
      %91 = vector.broadcast %90 : vector<1x32xf32> to vector<5x32xf32>
      %92 = arith.addf %89, %91 : vector<5x32xf32>
      %cst_68 = arith.constant 0.000000e+00 : f32
      %93 = vector.broadcast %cst_68 : f32 to vector<5x32xf32>
      %94 = arith.maximumf %92, %93 : vector<5x32xf32>
      %95 = arith.truncf %94 : vector<5x32xf32> to vector<5x32xbf16>
      %c0_69 = arith.constant 0 : index
      %c0_70 = arith.constant 0 : index
      %96 = vector.load %arg15[%c0_69, %c0_70] : memref<32x32xbf16, #tpu.memory_space<vmem>>, vector<32x32xbf16>
      %cst_71 = arith.constant dense<0.000000e+00> : vector<5x32xf32>
      %97 = tpu.matmul %95, %96, %cst_71 {dimension_numbers = #tpu.dot_dimension_numbers<[1], [0], [0], [1], [0, 0, 1, 1], [], []>} : vector<5x32xbf16>, vector<32x32xbf16>, vector<5x32xf32> -> vector<5x32xf32>
      %c0_72 = arith.constant 0 : index
      %c0_73 = arith.constant 0 : index
      %98 = vector.load %arg16[%c0_72, %c0_73] : memref<1x32xf32, #tpu.memory_space<vmem>>, vector<1x32xf32>
      %99 = vector.broadcast %98 : vector<1x32xf32> to vector<5x32xf32>
      %100 = arith.addf %97, %99 : vector<5x32xf32>
      %cst_74 = arith.constant 0.000000e+00 : f32
      %101 = vector.broadcast %cst_74 : f32 to vector<5x32xf32>
      %102 = arith.maximumf %100, %101 : vector<5x32xf32>
      %103 = arith.addf %102, %86 : vector<5x32xf32>
      %104 = arith.truncf %103 : vector<5x32xf32> to vector<5x32xbf16>
      %c0_75 = arith.constant 0 : index
      %c0_76 = arith.constant 0 : index
      %105 = vector.load %arg19[%c0_75, %c0_76] : memref<5x32xbf16, #tpu.memory_space<vmem>>, vector<5x32xbf16>
      tpu.vector_store %arg19[%c0_75, %c0_76], %104 {strides = array<i32>} : memref<5x32xbf16, #tpu.memory_space<vmem>>, vector<5x32xbf16>,
    } else {
    }
    %c0 = arith.constant 0 : index
    %c0_1 = arith.constant 0 : index
    %3 = vector.load %arg2[%c0, %c0_1] : memref<192x32xbf16, #tpu.memory_space<vmem>>, vector<192x32xbf16>
    %c0_2 = arith.constant 0 : index
    %c0_3 = arith.constant 0 : index
    %4 = vector.load %arg5[%c0_2, %c0_3] : memref<32x64xbf16, #tpu.memory_space<vmem>>, vector<32x64xbf16>
    %cst = arith.constant dense<0.000000e+00> : vector<192x64xf32>
    %5 = tpu.matmul %3, %4, %cst {dimension_numbers = #tpu.dot_dimension_numbers<[1], [0], [0], [1], [0, 0, 1, 1], [], []>} : vector<192x32xbf16>, vector<32x64xbf16>, vector<192x64xf32> -> vector<192x64xf32>
    %c0_4 = arith.constant 0 : index
    %c0_5 = arith.constant 0 : index
    %6 = vector.load %arg6[%c0_4, %c0_5] : memref<1x64xf32, #tpu.memory_space<vmem>>, vector<1x64xf32>
    %7 = vector.broadcast %6 : vector<1x64xf32> to vector<192x64xf32>
    %8 = arith.addf %5, %7 : vector<192x64xf32>
    %9 = vector.extract_strided_slice %8 {offsets = [0, 0], sizes = [192, 32], strides = [1, 1]} : vector<192x64xf32> to vector<192x32xf32>
    %cst_6 = arith.constant 0.000000e+00 : f32
    %10 = vector.broadcast %cst_6 : f32 to vector<192x32xf32>
    %11 = arith.maximumf %9, %10 : vector<192x32xf32>
    %12 = vector.extract_strided_slice %8 {offsets = [0, 32], sizes = [192, 32], strides = [1, 1]} : vector<192x64xf32> to vector<192x32xf32>
    %13 = arith.truncf %11 : vector<192x32xf32> to vector<192x32xbf16>
    %c0_7 = arith.constant 0 : index
    %c0_8 = arith.constant 0 : index
    %14 = vector.load %arg7[%c0_7, %c0_8] : memref<32x32xbf16, #tpu.memory_space<vmem>>, vector<32x32xbf16>
    %cst_9 = arith.constant dense<0.000000e+00> : vector<192x32xf32>
    %15 = tpu.matmul %13, %14, %cst_9 {dimension_numbers = #tpu.dot_dimension_numbers<[1], [0], [0], [1], [0, 0, 1, 1], [], []>} : vector<192x32xbf16>, vector<32x32xbf16>, vector<192x32xf32> -> vector<192x32xf32>
    %c0_10 = arith.constant 0 : index
    %c0_11 = arith.constant 0 : index
    %16 = vector.load %arg8[%c0_10, %c0_11] : memref<1x32xf32, #tpu.memory_space<vmem>>, vector<1x32xf32>
    %17 = vector.broadcast %16 : vector<1x32xf32> to vector<192x32xf32>
    %18 = arith.addf %15, %17 : vector<192x32xf32>
    %cst_12 = arith.constant 0.000000e+00 : f32
    %19 = vector.broadcast %cst_12 : f32 to vector<192x32xf32>
    %20 = arith.maximumf %18, %19 : vector<192x32xf32>
    %21 = arith.truncf %20 : vector<192x32xf32> to vector<192x32xbf16>
    %c0_13 = arith.constant 0 : index
    %c0_14 = arith.constant 0 : index
    %22 = vector.load %arg9[%c0_13, %c0_14] : memref<32x32xbf16, #tpu.memory_space<vmem>>, vector<32x32xbf16>
    %cst_15 = arith.constant dense<0.000000e+00> : vector<192x32xf32>
    %23 = tpu.matmul %21, %22, %cst_15 {dimension_numbers = #tpu.dot_dimension_numbers<[1], [0], [0], [1], [0, 0, 1, 1], [], []>} : vector<192x32xbf16>, vector<32x32xbf16>, vector<192x32xf32> -> vector<192x32xf32>
    %c0_16 = arith.constant 0 : index
    %c0_17 = arith.constant 0 : index
    %24 = vector.load %arg10[%c0_16, %c0_17] : memref<1x32xf32, #tpu.memory_space<vmem>>, vector<1x32xf32>
    %25 = vector.broadcast %24 : vector<1x32xf32> to vector<192x32xf32>
    %26 = arith.addf %23, %25 : vector<192x32xf32>
    %cst_18 = arith.constant 0.000000e+00 : f32
    %27 = vector.broadcast %cst_18 : f32 to vector<192x32xf32>
    %28 = arith.maximumf %26, %27 : vector<192x32xf32>
    %29 = arith.addf %28, %12 : vector<192x32xf32>
    %30 = arith.truncf %29 : vector<192x32xf32> to vector<192x32xbf16>
    %c0_19 = arith.constant 0 : index
    %c0_20 = arith.constant 0 : index
    %31 = vector.load %arg19[%c0_19, %c0_20] : memref<5x32xbf16, #tpu.memory_space<vmem>>, vector<5x32xbf16>
    %cst_21 = arith.constant dense<0.000000e+00> : vector<192x5xf32>
    %32 = tpu.matmul %30, %31, %cst_21 {dimension_numbers = #tpu.dot_dimension_numbers<[1], [1], [0], [0], [0, 0, 1, 0], [], []>} : vector<192x32xbf16>, vector<5x32xbf16>, vector<192x5xf32> -> vector<192x5xf32>
    %c0_22 = arith.constant 0 : index
    %c0_23 = arith.constant 0 : index
    %33 = vector.load %arg3[%c0_22, %c0_23] : memref<192x1xi32, #tpu.memory_space<vmem>>, vector<192x1xi32>
    %34 = tpu.iota {dimensions = array<i32: 1>} : vector<192x5xi32>
    %35 = vector.broadcast %33 : vector<192x1xi32> to vector<192x5xi32>
    %36 = arith.cmpi eq, %35, %34 : vector<192x5xi32>
    %c0_i32_24 = arith.constant 0 : i32
    %37 = vector.broadcast %c0_i32_24 : i32 to vector<192x1xi32>
    %38 = arith.cmpi sge, %33, %37 : vector<192x1xi32>
    %cst_25 = arith.constant dense<true> : vector<192x5xi1>
    %39 = arith.xori %36, %cst_25 : vector<192x5xi1>
    %40 = vector.broadcast %38 : vector<192x1xi1> to vector<192x5xi1>
    %41 = arith.andi %40, %39 : vector<192x5xi1>
    %cst_26 = arith.constant 0.000000e+00 : f32
    %42 = vector.broadcast %cst_26 : f32 to vector<192x5xf32>
    %43 = arith.subf %42, %32 : vector<192x5xf32>
    %cst_27 = arith.constant 0.000000e+00 : f32
    %44 = vector.broadcast %cst_27 : f32 to vector<192x5xf32>
    %45 = arith.maximumf %43, %44 : vector<192x5xf32>
    %46 = math.absf %32 : vector<192x5xf32>
    %cst_28 = arith.constant 0.000000e+00 : f32
    %47 = vector.broadcast %cst_28 : f32 to vector<192x5xf32>
    %48 = arith.subf %47, %46 : vector<192x5xf32>
    %49 = math.exp %48 : vector<192x5xf32>
    %50 = math.log1p %49 : vector<192x5xf32>
    %51 = arith.addf %45, %50 : vector<192x5xf32>
    %cst_29 = arith.constant 0.693147182 : f32
    %52 = vector.broadcast %cst_29 : f32 to vector<192x5xf32>
    %53 = arith.subf %52, %51 : vector<192x5xf32>
    %cst_30 = arith.constant 0.000000e+00 : f32
    %54 = vector.broadcast %cst_30 : f32 to vector<192x5xf32>
    %55 = arith.select %36, %53, %54 : vector<192x5xi1>, vector<192x5xf32>
    %56 = arith.addf %51, %32 : vector<192x5xf32>
    %cst_31 = arith.constant 0.693147182 : f32
    %57 = vector.broadcast %cst_31 : f32 to vector<192x5xf32>
    %58 = arith.subf %56, %57 : vector<192x5xf32>
    %cst_32 = arith.constant 0.000000e+00 : f32
    %59 = vector.broadcast %cst_32 : f32 to vector<192x5xf32>
    %60 = arith.select %41, %58, %59 : vector<192x5xi1>, vector<192x5xf32>
    %c0_33 = arith.constant 0 : index
    %c0_34 = arith.constant 0 : index
    %c0_35 = arith.constant 0 : index
    %61 = vector.load %arg17[%c0_33, %c0_34, %c0_35] : memref<1x1x5xf32, #tpu.memory_space<vmem>>, vector<1x1x5xf32>
    %cst_36 = arith.constant dense<0.000000e+00> : vector<5xf32>
    %62 = vector.multi_reduction <add>, %55, %cst_36 [0] : vector<192x5xf32> to vector<5xf32>
    %63 = vector.shape_cast %62 : vector<5xf32> to vector<1x5xf32>
    %64 = vector.shape_cast %63 : vector<1x5xf32> to vector<1x1x5xf32>
    %65 = arith.addf %61, %64 : vector<1x1x5xf32>
    %c0_37 = arith.constant 0 : index
    %c0_38 = arith.constant 0 : index
    %c0_39 = arith.constant 0 : index
    %66 = vector.load %arg17[%c0_37, %c0_38, %c0_39] : memref<1x1x5xf32, #tpu.memory_space<vmem>>, vector<1x1x5xf32>
    tpu.vector_store %arg17[%c0_37, %c0_38, %c0_39], %65 {strides = array<i32>} : memref<1x1x5xf32, #tpu.memory_space<vmem>>, vector<1x1x5xf32>,
    %c0_40 = arith.constant 0 : index
    %c0_41 = arith.constant 0 : index
    %c0_42 = arith.constant 0 : index
    %67 = vector.load %arg18[%c0_40, %c0_41, %c0_42] : memref<1x1x5xf32, #tpu.memory_space<vmem>>, vector<1x1x5xf32>
    %cst_43 = arith.constant dense<0.000000e+00> : vector<5xf32>
    %68 = vector.multi_reduction <add>, %60, %cst_43 [0] : vector<192x5xf32> to vector<5xf32>
    %69 = vector.shape_cast %68 : vector<5xf32> to vector<1x5xf32>
    %70 = vector.shape_cast %69 : vector<1x5xf32> to vector<1x1x5xf32>
    %71 = arith.addf %67, %70 : vector<1x1x5xf32>
    %c0_44 = arith.constant 0 : index
    %c0_45 = arith.constant 0 : index
    %c0_46 = arith.constant 0 : index
    %72 = vector.load %arg18[%c0_44, %c0_45, %c0_46] : memref<1x1x5xf32, #tpu.memory_space<vmem>>, vector<1x1x5xf32>
    tpu.vector_store %arg18[%c0_44, %c0_45, %c0_46], %71 {strides = array<i32>} : memref<1x1x5xf32, #tpu.memory_space<vmem>>, vector<1x1x5xf32>,
    return
  }
  func.func @transform_0(%arg0: i32, %arg1: i32) -> (i32, i32) {
    %c1_i32 = arith.constant 1 : i32
    %0 = arith.muli %arg0, %c1_i32 : i32
    %1 = arith.addi %0, %arg1 : i32
    %c1_i32_0 = arith.constant 1 : i32
    %2 = arith.minsi %1, %c1_i32_0 : i32
    %c0_i32 = arith.constant 0 : i32
    %c0_i32_1 = arith.constant 0 : i32
    return %2, %c0_i32 : i32, i32
  }
  func.func @transform_1(%arg0: i32, %arg1: i32) -> (i32, i32) {
    %c1_i32 = arith.constant 1 : i32
    %0 = arith.muli %arg0, %c1_i32 : i32
    %1 = arith.addi %0, %arg1 : i32
    %c0_i32 = arith.constant 0 : i32
    %c0_i32_0 = arith.constant 0 : i32
    return %1, %c0_i32 : i32, i32
  }
  func.func @transform_2(%arg0: i32, %arg1: i32) -> (i32, i32) {
    %c0_i32 = arith.constant 0 : i32
    %c0_i32_0 = arith.constant 0 : i32
    %c0_i32_1 = arith.constant 0 : i32
    return %c0_i32, %c0_i32_0 : i32, i32
  }
  func.func @transform_3(%arg0: i32, %arg1: i32) -> (i32, i32) {
    %c0_i32 = arith.constant 0 : i32
    %c0_i32_0 = arith.constant 0 : i32
    %c0_i32_1 = arith.constant 0 : i32
    return %c0_i32, %c0_i32_0 : i32, i32
  }
  func.func @transform_4(%arg0: i32, %arg1: i32) -> (i32, i32) {
    %c0_i32 = arith.constant 0 : i32
    %c0_i32_0 = arith.constant 0 : i32
    %c0_i32_1 = arith.constant 0 : i32
    return %c0_i32, %c0_i32_0 : i32, i32
  }
  func.func @transform_5(%arg0: i32, %arg1: i32) -> (i32, i32) {
    %c0_i32 = arith.constant 0 : i32
    %c0_i32_0 = arith.constant 0 : i32
    %c0_i32_1 = arith.constant 0 : i32
    return %c0_i32, %c0_i32_0 : i32, i32
  }
  func.func @transform_6(%arg0: i32, %arg1: i32) -> (i32, i32) {
    %c0_i32 = arith.constant 0 : i32
    %c0_i32_0 = arith.constant 0 : i32
    %c0_i32_1 = arith.constant 0 : i32
    return %c0_i32, %c0_i32_0 : i32, i32
  }
  func.func @transform_7(%arg0: i32, %arg1: i32) -> (i32, i32) {
    %c0_i32 = arith.constant 0 : i32
    %c0_i32_0 = arith.constant 0 : i32
    %c0_i32_1 = arith.constant 0 : i32
    return %c0_i32, %c0_i32_0 : i32, i32
  }
  func.func @transform_8(%arg0: i32, %arg1: i32) -> (i32, i32) {
    %c0_i32 = arith.constant 0 : i32
    %c0_i32_0 = arith.constant 0 : i32
    %c0_i32_1 = arith.constant 0 : i32
    return %c0_i32, %c0_i32_0 : i32, i32
  }
  func.func @transform_9(%arg0: i32, %arg1: i32) -> (i32, i32) {
    %c0_i32 = arith.constant 0 : i32
    %c0_i32_0 = arith.constant 0 : i32
    %c0_i32_1 = arith.constant 0 : i32
    return %c0_i32, %c0_i32_0 : i32, i32
  }
  func.func @transform_10(%arg0: i32, %arg1: i32) -> (i32, i32) {
    %c0_i32 = arith.constant 0 : i32
    %c0_i32_0 = arith.constant 0 : i32
    %c0_i32_1 = arith.constant 0 : i32
    return %c0_i32, %c0_i32_0 : i32, i32
  }
  func.func @transform_11(%arg0: i32, %arg1: i32) -> (i32, i32) {
    %c0_i32 = arith.constant 0 : i32
    %c0_i32_0 = arith.constant 0 : i32
    %c0_i32_1 = arith.constant 0 : i32
    return %c0_i32, %c0_i32_0 : i32, i32
  }
  func.func @transform_12(%arg0: i32, %arg1: i32) -> (i32, i32) {
    %c0_i32 = arith.constant 0 : i32
    %c0_i32_0 = arith.constant 0 : i32
    %c0_i32_1 = arith.constant 0 : i32
    return %c0_i32, %c0_i32_0 : i32, i32
  }
  func.func @transform_13(%arg0: i32, %arg1: i32) -> (i32, i32) {
    %c0_i32 = arith.constant 0 : i32
    %c0_i32_0 = arith.constant 0 : i32
    %c0_i32_1 = arith.constant 0 : i32
    return %c0_i32, %c0_i32_0 : i32, i32
  }
  func.func @transform_14(%arg0: i32, %arg1: i32) -> (i32, i32) {
    %c0_i32 = arith.constant 0 : i32
    %c0_i32_0 = arith.constant 0 : i32
    %c0_i32_1 = arith.constant 0 : i32
    return %c0_i32, %c0_i32_0 : i32, i32
  }
  func.func @transform_15(%arg0: i32, %arg1: i32) -> (i32, i32, i32) {
    %c0_i32 = arith.constant 0 : i32
    %c0_i32_0 = arith.constant 0 : i32
    %c0_i32_1 = arith.constant 0 : i32
    return %arg0, %c0_i32, %c0_i32_0 : i32, i32, i32
  }
  func.func @transform_16(%arg0: i32, %arg1: i32) -> (i32, i32, i32) {
    %c0_i32 = arith.constant 0 : i32
    %c0_i32_0 = arith.constant 0 : i32
    %c0_i32_1 = arith.constant 0 : i32
    return %arg0, %c0_i32, %c0_i32_0 : i32, i32, i32
  }
}

</mosaic_0001>

<bundles_post_ra>
// kernel: tpu_custom_call.1
= control target key start
LH: loop header
LB: loop body
LE: loop exit
PB: predicated region body
PF: predicated region fallthrough
CT: control target
= control target key end

     0   :  { %s4255_s0 = inlined_call_operand.vmem [shape: bf16[200,32], index: 0, kind: input, shape index: {}]   ;;  %s4256_s1 = inlined_call_operand.vmem [shape: s32[384,1], index: 1, kind: input, shape index: {}]   ;;  %s4257_s2 = inlined_call_operand.vmem [shape: bf16[5,32], index: 2, kind: input, shape index: {}]   ;;  %s4258_s3 = inlined_call_operand.vmem [shape: bf16[32,64], index: 3, kind: input, shape index: {}]   ;;  %s4259_s4 = inlined_call_operand.vmem [shape: f32[1,64], index: 4, kind: input, shape index: {}]   ;;  %s4260_s5 = inlined_call_operand.vmem [shape: bf16[32,32], index: 5, kind: input, shape index: {}]   ;;  %s4261_s6 = inlined_call_operand.vmem [shape: f32[1,32], index: 6, kind: input, shape index: {}]   ;;  %s4262_s7 = inlined_call_operand.vmem [shape: bf16[32,32], index: 7, kind: input, shape index: {}]   ;;  %s4263_s8 = inlined_call_operand.vmem [shape: f32[1,32], index: 8, kind: input, shape index: {}]   ;;  %s4264_s9 = inlined_call_operand.vmem [shape: bf16[32,64], index: 9, kind: input, shape index: {}]   ;;  %s4265_s10 = inlined_call_operand.vmem [shape: f32[1,64], index: 10, kind: input, shape index: {}]   ;;  %s4266_s11 = inlined_call_operand.vmem [shape: bf16[32,32], index: 11, kind: input, shape index: {}]   ;;  %s4267_s12 = inlined_call_operand.vmem [shape: f32[1,32], index: 12, kind: input, shape index: {}]   ;;  %s4268_s13 = inlined_call_operand.vmem [shape: bf16[32,32], index: 13, kind: input, shape index: {}]   ;;  %s4269_s14 = inlined_call_operand.vmem [shape: f32[1,32], index: 14, kind: input, shape index: {}]   ;;  %s4270_s15 = inlined_call_operand.hbm [shape: f32[2,1,5], index: 15, kind: output, shape index: {0}]   ;;  %s4271_s16 = inlined_call_operand.hbm [shape: f32[2,1,5], index: 16, kind: output, shape index: {1}]  }
   0x1   :  { %4276 = sst [smem:[#allocation14_spill]] %s4255_s0 }
   0x2   :  { %4277 = sst [smem:[#allocation15_spill]] %s4256_s1 }
   0x3   :  { %4278 = sst [smem:[#allocation16_spill]] %s4257_s2 }
   0x4   :  { %4279 = sst [smem:[#allocation17_spill]] %s4258_s3 }
   0x5   :  { %4280 = sst [smem:[#allocation18_spill]] %s4264_s9 }
   0x6   :  { %22 = vsyncpa [#allocation4], 0 }
   0x7   :  { %24 = vsyncpa [#allocation4 + $0x1], 0 }
   0x8   :  { %25 = vsyncpa [#allocation6], 0 }
   0x9   :  { %27 = vsyncpa [#allocation6 + $0x1], 0  ;;  %s3184_s21 = smov 0   ;;  %s3186_s22 = smov 0  }
   0xa   :  { %s3188_s23 = smov 0   ;;  %s3190_s24 = smov 0  }
   0xb   :  { %s3192_s25 = smov 0   ;;  %s3194_s26 = smov 0  }
   0xc LB: > { %4281 = sst [smem:[#allocation9_spill]] %s3073_s21  ;;  %s2610_s27 = sadd.s32 4294967295, %s3093_s26   ;;  %s3093_s26 = sphi %s3194_s26, %s33_s26   ;;  %s3089_s25 = sphi %s3192_s25, %s4317_s25   ;;  %s3085_s24 = sphi %s3190_s24, %s4316_s24   ;;  %s3081_s23 = sphi %s3188_s23, %s4315_s23   ;;  %s3077_s22 = sphi %s3186_s22, %s4319_s22   ;;  %s3073_s21 = sphi %s3184_s21, %s4318_s21  }
   0xd   : > { %4282 = sst [smem:[#allocation10_spill]] %s3081_s23  ;;  %s2611_s28 = sadd.s32 4294967294, %s3093_s26  }
   0xe   : > { %4283 = sst [smem:[#allocation11_spill]] %s3089_s25  ;;  %s45_s29 = sadd.s32 1, %s3089_s25 }
   0xf   : > { %s385_s30 = sadd.s32 1, %s3081_s23  ;;  %p47_p0 = scmp.ge.s32.totalorder %s45_s29, 2 }
  0x10   : > { %p395_p1 = scmp.ne.s32.totalorder %s3081_s23, %s3077_s22  ;;  %p396_p2 = scmp.eq.s32.totalorder %s2610_s27, 1 }
  0x11   : > { %p401_p3 = scmp.ne.s32.totalorder %s3077_s22, %s3073_s21  ;;  %s4321_s29 = smov (%p47_p0, %s45_s29), 0 }
  0x12   : > { %4284 = sst [smem:[#allocation12_spill]] %s4321_s29  ;;  %p3224_p4 = por %p396_p2, %p395_p1 }
  0x13   : > { %p402_p5 = scmp.eq.s32.totalorder %s2611_s28, 1  ;;  %s382_s17 = ssub.s32 %s3089_s25, %s4321_s29 }
  0x14   : > { %p2614_p6 = scmp.ge.s32.totalorder %s3093_s26, 1  ;;  %p383_p7 = scmp.eq.s32.totalorder %s382_s17, 0 }
  0x15   : > { %p3231_p8 = por %p402_p5, %p401_p3  ;;  %p519_p9 = scmp.lt.s32.totalorder %s3093_s26, 3 }
  0x16   : > { %s3237_s19 = scalar_select %p383_p7, %s3081_s23, %s385_s30  }
  0x17   : > { %p520_p10 = pnand %p2614_p6, %p519_p9 }
  0x18   : > { %4287 = sst [smem:[#allocation13_spill]] %s3237_s19  ;;  %p586_p11 = scmp.lt.s32.totalorder (!%p520_p10), %s3085_s24, 1 }
  0x19   : > { %523 = sbr.rel (%p520_p10) target bundleno = 846 (0x34e), region = 80  ;;  %s4288_s9 = sld [smem:[#allocation18_spill]] (!%p520_p10) }
  0x1a   : > { %s4289_s3 = sld [smem:[#allocation17_spill]] (!%p520_p10)  ;;  %s3095_s23 = smov (!%p520_p10), 96  }
  0x1b   : > { %s4290_s2 = sld [smem:[#allocation16_spill]] (!%p520_p10) }
  0x1c   : > { %s4291_s17 = sld [smem:[#allocation14_spill]] (!%p520_p10) }
  0x1d   : > { %s4292_s1 = sld [smem:[#allocation15_spill]] (!%p520_p10) }
  0x1e   : > { %s587_s19 = scalar_select %p586_p11, %s3085_s24, 1  ;;  %vm642_vm0 = vcmask 261120   ;;  %v2793_v11 = vld [vmem:[%s4266_s11 + $0x8] sm:$0xff]  ;;  %v2792_v12 = vld [vmem:[%s4266_s11] sm:$0xff]  ;;  %vm742_vm1 = vcmask 256000  }
  0x1f   : > { %v2791_v0 = vld [vmem:[%s4288_s9 + $0x8] sm:$0xff]  ;;  %v2790_v2 = vld [vmem:[%s4288_s9] sm:$0xff]  ;;  %690 = vmatpush.bf16.msra.mxu1 %v2793_v11  ;;  %vm743_vm2 = vsmask.f32 2304 }
  0x20   : > { %v2809_v1 = vld [vmem:[%s4289_s3 + $0x8] sm:$0xff]  ;;  %652 = vmatpush.bf16.msra.mxu0 %v2791_v0  ;;  %v2808_v3 = vld [vmem:[%s4289_s3] sm:$0xff]  ;;  %s588_s20 = smul.u32 24, %s587_s19  ;;  %vm744_vm3 = vmand %vm742_vm1, %vm743_vm2 }
  0x21   : > { %895 = vmatpush.bf16.msra.mxu3 %v2809_v1  ;;  %v621_v4 = vld [vmem:[%s4290_s2] sm:$0x7]  ;;  %v2811_v14 = vld [vmem:[%s4260_s5 + $0x8] sm:$0xff] }
  0x22   : > { %p593_p12 = scmp.lt.s32.totalorder %s588_s20, 24  ;;  %v2810_v15 = vld [vmem:[%s4260_s5] sm:$0xff]  ;;  %v2795_v1 = vld [vmem:[%s4268_s13 + $0x8] sm:$0xff] }
  0x23   : > { %691 = vmatpush.bf16.msra.mxu1 %v2792_v12  ;;  %v2881_v17 = vld [vmem:[%s4265_s10] ss:$0 sm:$0xff]  ;;  %728 = vmatpush.bf16.msra.mxu2 %v2795_v1 }
  0x24   : > { %653 = vmatpush.bf16.msra.mxu0 %v2790_v2  ;;  %s4323_s20 = smov (!%p593_p12, %s588_s20), 24  ;;  %v3300_v24 = vld [vmem:[%s4259_s4] ss:$0 sm:$0xff] }
  0x25   : > { %896 = vmatpush.bf16.msra.mxu3 %v2808_v3  ;;  %s2615_s21 = sshll.u32 %s4323_s20, 2 }
  0x26   : > { %s3260_s9 = scalar_lea.vmem %s4291_s17, %s2615_s21  ;;  %s2490_s21 = scalar_lea.hbm %s4270_s15, %s3085_s24 }
  0x27   : > { %2625 = vmatmul.msk.bf16.vlgmr.msra.gmra.mxu0 %vm642_vm0, %v621_v4  ;;  %v2796_v5 = vld [vmem:[%s3260_s9] sm:$0xff]  ;;  %v2797_v6 = vld [vmem:[%s3260_s9 + $0x8] sm:$0xff]  ;;  %v2798_v7 = vld [vmem:[%s3260_s9 + $0x10] sm:$0xff]  ;;  %s2503_s17 = scalar_lea.hbm %s4271_s16, %s3085_s24  ;;  %s4192_s19 = sshll.u32 %s2490_s21, 4  ;;  %s2495_s19 = int_to_ptr.hbm [resolvable:$true] %s4192_s19 }
  0x28   : > { %2700 = vmatmul.msk.bf16.vlgmr.msra.gmra.mxu3 %vm642_vm0, %v2796_v5  ;;  %v2799_v8 = vld [vmem:[%s3260_s9 + $0x18] sm:$0xff]  ;;  %v2800_v9 = vld [vmem:[%s3260_s9 + $0x20] sm:$0xff]  ;;  %v2801_v10 = vld [vmem:[%s3260_s9 + $0x28] sm:$0xff]  ;;  %1056 = vmatpush.bf16.msrb.mxu0 %v2811_v14  ;;  %s2997_s27 = sshra.s32 %s2495_s19, 4  ;;  %s2998_s27 = int_to_ptr.hbm [resolvable:$true] %s2997_s27 }
  0x29   : > { %v2802_v13 = vld [vmem:[%s3260_s9 + $0x30] sm:$0xff]  ;;  %v2803_v16 = vld [vmem:[%s3260_s9 + $0x38] sm:$0xff]  ;;  %v2804_v21 = vld [vmem:[%s3260_s9 + $0x40] sm:$0xff]  ;;  %s2999_s21 = scalar_lea.hbm %s2998_s27, 1  ;;  %p3004_p3 = scmp.lt.s32.totalorder %s2998_s27, %s4270_s15 }
  0x2a   : > { %v2805_v29 = vld [vmem:[%s3260_s9 + $0x48] sm:$0xff]  ;;  %v2806_v37 = vld [vmem:[%s3260_s9 + $0x50] sm:$0xff]  ;;  %v2807_v45 = vld [vmem:[%s3260_s9 + $0x58] sm:$0xff]  ;;  %s4124_s9 = sand.u32 1, %s3077_s22   ;;  %p3000_p0 = scmp.ne.s32.totalorder %s2998_s27, %s2999_s21 }
  0x2b   : > { %v2813_v14 = vld [vmem:[%s4262_s7 + $0x8] sm:$0xff]  ;;  %s4134_s30 = scalar_lea.vmem [#allocation3], %s4124_s9 }
  0x2c   : > { %1057 = vmatpush.bf16.msrb.mxu0 %v2810_v15  ;;  %1217 = vmatpush.bf16.msrb.mxu1 %v2813_v14  ;;  %s2492_s25 = sshll.u32 %s4134_s30, 4  ;;  %p3001_p1 = pnand %p3000_p0, %p3224_p4  ;;  %s2493_s25 = int_to_ptr.vmem [resolvable:$true] %s2492_s25 }
  0x2e   : > { %p3002_p2 = pneg %p3001_p1 }
  0x38   : > { %2701 = vmatmul.msk.bf16.gmra.mxu3 %vm642_vm0, %v2797_v6  ;;  %v2794_v6 = vld [vmem:[%s4268_s13] sm:$0xff] }
  0x39   : > { %729 = vmatpush.bf16.msra.mxu2 %v2794_v6 }
  0x48   : > { %2702 = vmatmul.msk.bf16.gmra.mxu3 %vm642_vm0, %v2798_v7 }
  0x58   : > { %2703 = vmatmul.msk.bf16.gmra.mxu3 %vm642_vm0, %v2799_v8 }
  0x68   : > { %2704 = vmatmul.msk.bf16.gmra.mxu3 %vm642_vm0, %v2800_v9 }
  0x78   : > { %2705 = vmatmul.msk.bf16.gmra.mxu3 %vm642_vm0, %v2801_v10 }
  0x88   : > { %2706 = vmatmul.msk.bf16.gmra.mxu3 %vm642_vm0, %v2802_v13 }
  0x98   : > { %2707 = vmatmul.msk.bf16.gmra.mxu3 %vm642_vm0, %v2803_v16 }
  0xa4   : > { %v655_v18 = vpop.f32.mrf.mxu0 }
  0xa5   : > { %v656_v19 = vadd.f32 %v2881_v17, %v655_v18  ;;  %v2812_v18 = vld [vmem:[%s4262_s7] sm:$0xff] }
  0xa6   : > { %1218 = vmatpush.bf16.msrb.mxu1 %v2812_v18 }
  0xa7   : > { %v659_v20 = vmax.f32 %v656_v19, 0.0  ;;  %737 = vrot.lane.b32.xlu0 %v656_v19, %s3095_s23  ;;  %v2883_v19 = vld [vmem:[%s4267_s12] ss:$0 sm:$0xff] }
  0xa8   : > { %2708 = vmatmul.msk.bf16.gmra.mxu3 %vm642_vm0, %v2804_v21 }
  0xa9   : > { %v660_v22 = vpack.c.bf16 %v659_v20, %v659_v20 }
  0xab   : > { %2634 = vmatmul.msk.bf16.vlgmr.msra.gmra.mxu1 %vm642_vm0, %v660_v22  ;;  %v898_v25 = vpop.f32.mrf.mxu3 }
  0xac   : > { %v657_v23 = vpop.f32.mrf.mxu0  ;;  %v899_v26 = vadd.f32 %v3300_v24, %v898_v25 }
  0xae   : > { %v958_v30 = vmax.f32 %v899_v26, 0.0 }
  0xaf   : > { %1328 = vrot.lane.b32.xlu0 %v899_v26, %s3095_s23 }
  0xb3   : > { %v900_v27 = vpop.f32.mrf.mxu3 }
  0xb4   : > { %v901_v28 = vadd.f32 %v3300_v24, %v900_v27 }
  0xb6   : > { %v959_v31 = vmax.f32 %v901_v28, 0.0  ;;  %1330 = vrot.lane.b32.xlu1 %v901_v28, %s3095_s23 }
  0xb8   : > { %v982_v32 = vpack.c.bf16 %v959_v31, %v958_v30  ;;  %2709 = vmatmul.msk.bf16.gmra.mxu3 %vm642_vm0, %v2805_v29 }
  0xba   : > { %2720 = vmatmul.msk.bf16.vlgmr.msrb.gmra.mxu0 %vm642_vm0, %v982_v32 }
  0xbb   : > { %v903_v33 = vpop.f32.mrf.mxu3 }
  0xbc   : > { %v904_v34 = vadd.f32 %v3300_v24, %v903_v33 }
  0xbe   : > { %1332 = vrot.lane.b32.xlu1 %v904_v34, %s3095_s23  ;;  %v960_v38 = vmax.f32 %v904_v34, 0.0 }
  0xc3   : > { %v905_v35 = vpop.f32.mrf.mxu3 }
  0xc4   : > { %v906_v36 = vadd.f32 %v3300_v24, %v905_v35 }
  0xc6   : > { %v961_v39 = vmax.f32 %v906_v36, 0.0  ;;  %1334 = vrot.lane.b32.xlu2 %v906_v36, %s3095_s23 }
  0xc8   : > { %2710 = vmatmul.msk.bf16.gmra.mxu3 %vm642_vm0, %v2806_v37  ;;  %v983_v40 = vpack.c.bf16 %v961_v39, %v960_v38  ;;  %v3371_v39 = vld [vmem:[%s4261_s6] ss:$0 sm:$0xff] }
  0xca   : > { %2721 = vmatmul.msk.bf16.gmra.mxu0 %vm642_vm0, %v983_v40 }
  0xcb   : > { %v908_v41 = vpop.f32.mrf.mxu3 }
  0xcc   : > { %v909_v42 = vadd.f32 %v3300_v24, %v908_v41 }
  0xce   : > { %1336 = vrot.lane.b32.xlu2 %v909_v42, %s3095_s23  ;;  %v962_v46 = vmax.f32 %v909_v42, 0.0 }
  0xd3   : > { %v910_v43 = vpop.f32.mrf.mxu3 }
  0xd4   : > { %v911_v44 = vadd.f32 %v3300_v24, %v910_v43 }
  0xd6   : > { %v963_v47 = vmax.f32 %v911_v44, 0.0  ;;  %1338 = vrot.lane.b32.xlu0 %v911_v44, %s3095_s23 }
  0xd8   : > { %2711 = vmatmul.msk.bf16.gmra.mxu3 %vm642_vm0, %v2807_v45  ;;  %v984_v48 = vpack.c.bf16 %v963_v47, %v962_v46 }
  0xda   : > { %2722 = vmatmul.msk.bf16.gmra.mxu0 %vm642_vm0, %v984_v48 }
  0xdb   : > { %v913_v49 = vpop.f32.mrf.mxu3 }
  0xdc   : > { %v914_v50 = vadd.f32 %v3300_v24, %v913_v49 }
  0xde   : > { %1340 = vrot.lane.b32.xlu1 %v914_v50, %s3095_s23  ;;  %v964_v53 = vmax.f32 %v914_v50, 0.0 }
  0xe3   : > { %v915_v51 = vpop.f32.mrf.mxu3 }
  0xe4   : > { %v916_v52 = vadd.f32 %v3300_v24, %v915_v51 }
  0xe6   : > { %v965_v54 = vmax.f32 %v916_v52, 0.0  ;;  %1342 = vrot.lane.b32.xlu2 %v916_v52, %s3095_s23 }
  0xe8   : > { %v985_v55 = vpack.c.bf16 %v965_v54, %v964_v53 }
  0xea   : > { %2723 = vmatmul.msk.bf16.gmra.mxu0 %vm642_vm0, %v985_v55 }
  0xeb   : > { %v918_v56 = vpop.f32.mrf.mxu3 }
  0xec   : > { %v919_v57 = vadd.f32 %v3300_v24, %v918_v56 }
  0xee   : > { %1344 = vrot.lane.b32.xlu0 %v919_v57, %s3095_s23  ;;  %v966_v60 = vmax.f32 %v919_v57, 0.0 }
  0xf3   : > { %v920_v58 = vpop.f32.mrf.mxu3 }
  0xf4   : > { %v921_v59 = vadd.f32 %v3300_v24, %v920_v58 }
  0xf6   : > { %v967_v61 = vmax.f32 %v921_v59, 0.0  ;;  %1346 = vrot.lane.b32.xlu1 %v921_v59, %s3095_s23 }
  0xf8   : > { %v986_v62 = vpack.c.bf16 %v967_v61, %v966_v60 }
  0xfa   : > { %2724 = vmatmul.msk.bf16.gmra.mxu0 %vm642_vm0, %v986_v62 }
  0xfb   : > { %v923_v63 = vpop.f32.mrf.mxu3 }
  0xfc   : > { %v924_v0 = vadd.f32 %v3300_v24, %v923_v63 }
  0xfe   : > { %1348 = vrot.lane.b32.xlu2 %v924_v0, %s3095_s23  ;;  %v968_v4 = vmax.f32 %v924_v0, 0.0 }
 0x103   : > { %v925_v2 = vpop.f32.mrf.mxu3 }
 0x104   : > { %v926_v3 = vadd.f32 %v3300_v24, %v925_v2 }
 0x106   : > { %v969_v5 = vmax.f32 %v926_v3, 0.0  ;;  %1350 = vrot.lane.b32.xlu0 %v926_v3, %s3095_s23 }
 0x108   : > { %v987_v7 = vpack.c.bf16 %v969_v5, %v968_v4 }
 0x10a   : > { %2725 = vmatmul.msk.bf16.gmra.mxu0 %vm642_vm0, %v987_v7 }
 0x10b   : > { %v928_v8 = vpop.f32.mrf.mxu3 }
 0x10c   : > { %v929_v9 = vadd.f32 %v3300_v24, %v928_v8 }
 0x10e   : > { %1352 = vrot.lane.b32.xlu1 %v929_v9, %s3095_s23  ;;  %v970_v12 = vmax.f32 %v929_v9, 0.0 }
 0x113   : > { %v930_v10 = vpop.f32.mrf.mxu3 }
 0x114   : > { %v931_v11 = vadd.f32 %v3300_v24, %v930_v10 }
 0x116   : > { %v971_v13 = vmax.f32 %v931_v11, 0.0  ;;  %1354 = vrot.lane.b32.xlu2 %v931_v11, %s3095_s23 }
 0x118   : > { %v988_v15 = vpack.c.bf16 %v971_v13, %v970_v12 }
 0x11a   : > { %2726 = vmatmul.msk.bf16.gmra.mxu0 %vm642_vm0, %v988_v15 }
 0x11b   : > { %v933_v16 = vpop.f32.mrf.mxu3 }
 0x11c   : > { %v934_v17 = vadd.f32 %v3300_v24, %v933_v16 }
 0x11e   : > { %1356 = vrot.lane.b32.xlu0 %v934_v17, %s3095_s23  ;;  %v972_v25 = vmax.f32 %v934_v17, 0.0 }
 0x123   : > { %v935_v20 = vpop.f32.mrf.mxu3 }
 0x124   : > { %v936_v21 = vadd.f32 %v3300_v24, %v935_v20 }
 0x126   : > { %v973_v26 = vmax.f32 %v936_v21, 0.0  ;;  %1358 = vrot.lane.b32.xlu1 %v936_v21, %s3095_s23 }
 0x128   : > { %v693_v22 = vpop.f32.mrf.mxu1  ;;  %v989_v28 = vpack.c.bf16 %v973_v26, %v972_v25 }
 0x129   : > { %v694_v23 = vadd.f32 %v2883_v19, %v693_v22 }
 0x12a   : > { %2727 = vmatmul.msk.bf16.gmra.mxu0 %vm642_vm0, %v989_v28 }
 0x12b   : > { %v697_v27 = vmax.f32 %v694_v23, 0.0  ;;  %v938_v30 = vpop.f32.mrf.mxu3 }
 0x12c   : > { %v939_v31 = vadd.f32 %v3300_v24, %v938_v30 }
 0x12d   : > { %v698_v29 = vpack.c.bf16 %v697_v27, %v697_v27 }
 0x12e   : > { %1360 = vrot.lane.b32.xlu2 %v939_v31, %s3095_s23  ;;  %v974_v35 = vmax.f32 %v939_v31, 0.0 }
 0x12f   : > { %2643 = vmatmul.msk.bf16.vlgmr.msra.gmra.mxu2 %vm642_vm0, %v698_v29 }
 0x130   : > { %v695_v32 = vpop.f32.mrf.mxu1 }
 0x133   : > { %v940_v33 = vpop.f32.mrf.mxu3 }
 0x134   : > { %v941_v34 = vadd.f32 %v3300_v24, %v940_v33 }
 0x136   : > { %v975_v36 = vmax.f32 %v941_v34, 0.0  ;;  %1362 = vrot.lane.b32.xlu0 %v941_v34, %s3095_s23 }
 0x137   : > { %v1059_v37 = vpop.f32.mrf.mxu0 }
 0x138   : > { %v990_v38 = vpack.c.bf16 %v975_v36, %v974_v35  ;;  %v1060_v42 = vadd.f32 %v3371_v39, %v1059_v37 }
 0x13a   : > { %2728 = vmatmul.msk.bf16.gmra.mxu0 %vm642_vm0, %v990_v38  ;;  %v1119_v45 = vmax.f32 %v1060_v42, 0.0 }
 0x13b   : > { %v943_v40 = vpop.f32.mrf.mxu3 }
 0x13c   : > { %v944_v41 = vadd.f32 %v3300_v24, %v943_v40  ;;  %v3096_v40 = vmov 0  }
 0x13d   : > { %2878 = vset.pattern.permute.xlu1 %v3096_v40  ;;  %2880 = vset.pattern.permute.xlu0 %v3096_v40 }
 0x13e   : > { %1364 = vrot.lane.b32.xlu1 %v944_v41, %s3095_s23  ;;  %v976_v50 = vmax.f32 %v944_v41, 0.0  ;;  %2879 = vset.pattern.permute.xlu2 %v3096_v40 }
 0x13f   : > { %v1061_v43 = vpop.f32.mrf.mxu0 }
 0x140   : > { %v1062_v44 = vadd.f32 %v3371_v39, %v1061_v43 }
 0x142   : > { %v1120_v46 = vmax.f32 %v1062_v44, 0.0 }
 0x143   : > { %v945_v47 = vpop.f32.mrf.mxu3 }
 0x144   : > { %v1143_v48 = vpack.c.bf16 %v1120_v46, %v1119_v45  ;;  %v946_v49 = vadd.f32 %v3300_v24, %v945_v47 }
 0x146   : > { %v977_v51 = vmax.f32 %v946_v49, 0.0  ;;  %1366 = vrot.lane.b32.xlu2 %v946_v49, %s3095_s23  ;;  %2740 = vmatmul.msk.bf16.vlgmr.msrb.gmra.mxu1 %vm642_vm0, %v1143_v48 }
 0x147   : > { %v1064_v52 = vpop.f32.mrf.mxu0 }
 0x148   : > { %v991_v53 = vpack.c.bf16 %v977_v51, %v976_v50  ;;  %v1065_v56 = vadd.f32 %v3371_v39, %v1064_v52  ;;  %v2885_v51 = vld [vmem:[%s4269_s14] ss:$0 sm:$0xff] }
 0x14a   : > { %2729 = vmatmul.msk.bf16.gmra.mxu0 %vm642_vm0, %v991_v53  ;;  %v1121_v59 = vmax.f32 %v1065_v56, 0.0 }
 0x14b   : > { %v948_v54 = vpop.f32.mrf.mxu3 }
 0x14c   : > { %v949_v55 = vadd.f32 %v3300_v24, %v948_v54 }
 0x14e   : > { %1368 = vrot.lane.b32.xlu0 %v949_v55, %s3095_s23  ;;  %v978_v0 = vmax.f32 %v949_v55, 0.0 }
 0x14f   : > { %v1066_v57 = vpop.f32.mrf.mxu0 }
 0x150   : > { %v1067_v58 = vadd.f32 %v3371_v39, %v1066_v57 }
 0x152   : > { %v1122_v60 = vmax.f32 %v1067_v58, 0.0 }
 0x153   : > { %v950_v61 = vpop.f32.mrf.mxu3 }
 0x154   : > { %v1144_v62 = vpack.c.bf16 %v1122_v60, %v1121_v59  ;;  %v951_v63 = vadd.f32 %v3300_v24, %v950_v61  ;;  %v738_v60 = vpop.permute.xlu0 %737 }
 0x156   : > { %v979_v1 = vmax.f32 %v951_v63, 0.0  ;;  %1370 = vrot.lane.b32.xlu1 %v951_v63, %s3095_s23  ;;  %2741 = vmatmul.msk.bf16.gmra.mxu1 %vm642_vm0, %v1144_v62 }
 0x157   : > { %v1069_v2 = vpop.f32.mrf.mxu0 }
 0x158   : > { %v992_v3 = vpack.c.bf16 %v979_v1, %v978_v0  ;;  %v1070_v6 = vadd.f32 %v3371_v39, %v1069_v2  ;;  %v745_v0 = vld [vmem:[#allocation2] sm:$0x7] }
 0x15a   : > { %2730 = vmatmul.msk.bf16.gmra.mxu0 %vm642_vm0, %v992_v3  ;;  %v1123_v9 = vmax.f32 %v1070_v6, 0.0 }
 0x15b   : > { %v953_v4 = vpop.f32.mrf.mxu3 }
 0x15c   : > { %v954_v5 = vadd.f32 %v3300_v24, %v953_v4 }
 0x15e   : > { %1372 = vrot.lane.b32.xlu2 %v954_v5, %s3095_s23  ;;  %v980_v14 = vmax.f32 %v954_v5, 0.0 }
 0x15f   : > { %v1071_v7 = vpop.f32.mrf.mxu0 }
 0x160   : > { %v1072_v8 = vadd.f32 %v3371_v39, %v1071_v7 }
 0x162   : > { %v1124_v10 = vmax.f32 %v1072_v8, 0.0 }
 0x163   : > { %v955_v11 = vpop.f32.mrf.mxu3 }
 0x164   : > { %v1145_v12 = vpack.c.bf16 %v1124_v10, %v1123_v9  ;;  %v956_v13 = vadd.f32 %v3300_v24, %v955_v11 }
 0x166   : > { %v981_v15 = vmax.f32 %v956_v13, 0.0  ;;  %1374 = vrot.lane.b32.xlu0 %v956_v13, %s3095_s23  ;;  %2742 = vmatmul.msk.bf16.gmra.mxu1 %vm642_vm0, %v1145_v12  ;;  %s606_s23 = smul.u32 24, %s3085_s24  ;;  %s2478_s24 = scalar_lea.sflag [#allocation4], %s4124_s9 }
 0x167   : > { %v1074_v16 = vpop.f32.mrf.mxu0 }
 0x168   : > { %v993_v17 = vpack.c.bf16 %v981_v15, %v980_v14  ;;  %v1075_v18 = vadd.f32 %v3371_v39, %v1074_v16  ;;  %p607_p13 = scmp.lt.s32.totalorder %s606_s23, 47 }
 0x16a   : > { %2731 = vmatmul.msk.bf16.gmra.mxu0 %vm642_vm0, %v993_v17  ;;  %v1125_v21 = vmax.f32 %v1075_v18, 0.0  ;;  %s4325_s23 = smov (!%p607_p13, %s606_s23), 47 }
 0x16b   : > { %s2616_s20 = sshll.u32 %s4325_s23, 3  ;;  %s4139_s23 = scalar_lea.vmem [#allocation5], %s4124_s9 }
 0x16c   : > { %s3411_s29 = scalar_lea.vmem %s4292_s1, %s2616_s20  ;;  %s2505_s1 = sshll.u32 %s4139_s23, 4  ;;  %s4201_s1 = int_to_ptr.vmem [resolvable:$true] %s2505_s1 }
 0x16d   : > { %v3415_v41 = vld [vmem:[%s3411_s29] sm:$0xff]  ;;  %v3423_v45 = vld [vmem:[%s3411_s29 + $0x18] sm:$0xff]  ;;  %v3428_v50 = vld [vmem:[%s3411_s29 + $0x28] sm:$0xff]  ;;  %s4196_s20 = sshll.u32 %s2503_s17, 4  ;;  %s3003_s17 = scalar_lea.hbm %s4270_s15, 2  ;;  %s2508_s20 = int_to_ptr.hbm [resolvable:$true] %s4196_s20 }
 0x16e   : > { %1572 = vperm.xlu1 %2878, %v3415_v41   ;;  %v3437_v58 = vld [vmem:[%s3411_s29 + $0x40] sm:$0xff]  ;;  %v3440_v59 = vld [vmem:[%s3411_s29 + $0x10] sm:$0xff]  ;;  %v3446_v6 = vld [vmem:[%s3411_s29 + $0x8] sm:$0xff]  ;;  %vm1672_vm5 = vcmp.ge.s32.totalorder %v3428_v50, 0  ;;  %vm1667_vm9 = vcmp.ge.s32.totalorder %v3415_v41, 0  ;;  %vm1670_vm13 = vcmp.ge.s32.totalorder %v3423_v45, 0  ;;  %p3005_p5 = scmp.lt.s32.totalorder %s3003_s17, %s2999_s21 }
 0x16f   : > { %v1076_v19 = vpop.f32.mrf.mxu0  ;;  %1578 = vperm.xlu0 %2880, %v3440_v59   ;;  %v3449_v7 = vld [vmem:[%s3411_s29 + $0x58] sm:$0xff]  ;;  %1575 = vperm.xlu2 %2879, %v3446_v6   ;;  %v3461_v14 = vld [vmem:[%s3411_s29 + $0x20] sm:$0xff]  ;;  %v3464_v15 = vld [vmem:[%s3411_s29 + $0x70] sm:$0xff]  ;;  %vm1669_vm4 = vcmp.ge.s32.totalorder %v3440_v59, 0  ;;  %vm1668_vm6 = vcmp.ge.s32.totalorder %v3446_v6, 0  ;;  %vm1675_vm7 = vcmp.ge.s32.totalorder %v3437_v58, 0 }
 0x170   : > { %v1077_v20 = vadd.f32 %v3371_v39, %v1076_v19  ;;  %v3452_v8 = vld [vmem:[%s3411_s29 + $0x38] sm:$0xff]  ;;  %v3467_v16 = vld [vmem:[%s3411_s29 + $0x50] sm:$0xff]  ;;  %vm1671_vm8 = vcmp.ge.s32.totalorder %v3461_v14, 0  ;;  %vm1678_vm10 = vcmp.ge.s32.totalorder %v3449_v7, 0  ;;  %vm1681_vm12 = vcmp.ge.s32.totalorder %v3464_v15, 0  ;;  %p3006_p6 = por %p3005_p5, %p3004_p3 }
 0x171   : > { %vm1674_vm11 = vcmp.ge.s32.totalorder %v3452_v8, 0  ;;  %vm1677_vm14 = vcmp.ge.s32.totalorder %v3467_v16, 0 }
 0x172   : > { %v1126_v22 = vmax.f32 %v1077_v20, 0.0  ;;  %v1722_v41 = vsel %vm1674_vm11, 1, %v3096_v40  ;;  %p3007_p7 = pnand %p3006_p6, %p3002_p2 }
 0x174   : > { %v1146_v23 = vpack.c.bf16 %v1126_v22, %v1125_v21  ;;  %v3475_v21 = vld [vmem:[%s4263_s8] ss:$0 sm:$0xff] }
 0x176   : > { %2743 = vmatmul.msk.bf16.gmra.mxu1 %vm642_vm0, %v1146_v23  ;;  %1581 = vperm.xlu1 %2878, %v3423_v45  }
 0x177   : > { %v1079_v24 = vpop.f32.mrf.mxu0  ;;  %1593 = vperm.xlu0 %2880, %v3452_v8   ;;  %1584 = vperm.xlu2 %2879, %v3461_v14   ;;  %v1718_v8 = vsel %vm1670_vm13, 1, %v3096_v40 }
 0x178   : > { %v1080_v25 = vadd.f32 %v3371_v39, %v1079_v24  ;;  %v3480_v24 = vld [vmem:[%s3411_s29 + $0x30] sm:$0xff] }
 0x179   : > { %vm1673_vm1 = vcmp.ge.s32.totalorder %v3480_v24, 0 }
 0x17a   : > { %v1127_v28 = vmax.f32 %v1080_v25, 0.0  ;;  %v3483_v25 = vld [vmem:[%s3411_s29 + $0x88] sm:$0xff] }
 0x17b   : > { %vm1684_vm15 = vcmp.ge.s32.totalorder %v3483_v25, 0 }
 0x17e   : > { %1587 = vperm.xlu1 %2878, %v3428_v50  }
 0x17f   : > { %v1081_v26 = vpop.f32.mrf.mxu0  ;;  %1602 = vperm.xlu0 %2880, %v3467_v16   ;;  %1590 = vperm.xlu2 %2879, %v3480_v24   ;;  %v1721_v16 = vsel %vm1673_vm1, 1, %v3096_v40 }
 0x180   : > { %v1082_v27 = vadd.f32 %v3371_v39, %v1081_v26  ;;  %v3486_v26 = vld [vmem:[%s3411_s29 + $0x68] sm:$0xff] }
 0x181   : > { %vm1680_vm2 = vcmp.ge.s32.totalorder %v3486_v26, 0 }
 0x182   : > { %v1128_v29 = vmax.f32 %v1082_v27, 0.0 }
 0x184   : > { %v1147_v30 = vpack.c.bf16 %v1128_v29, %v1127_v28 }
 0x186   : > { %2744 = vmatmul.msk.bf16.gmra.mxu1 %vm642_vm0, %v1147_v30  ;;  %1596 = vperm.xlu1 %2878, %v3437_v58   ;;  %v1329_v30 = vpop.permute.xlu0 %1328  ;;  %v1719_v58 = vsel %vm1671_vm8, 1, %v3096_v40 }
 0x187   : > { %v1084_v31 = vpop.f32.mrf.mxu0  ;;  %1611 = vperm.xlu0 %2880, %v3486_v26  }
 0x188   : > { %v1085_v32 = vadd.f32 %v3371_v39, %v1084_v31 }
 0x18a   : > { %v1129_v35 = vmax.f32 %v1085_v32, 0.0 }
 0x18e   : > { %1605 = vperm.xlu1 %2878, %v3449_v7  }
 0x18f   : > { %v1086_v33 = vpop.f32.mrf.mxu0 }
 0x190   : > { %v1087_v34 = vadd.f32 %v3371_v39, %v1086_v33  ;;  %v1331_v33 = vpop.permute.xlu1 %1330 }
 0x192   : > { %v1130_v36 = vmax.f32 %v1087_v34, 0.0 }
 0x194   : > { %v1148_v37 = vpack.c.bf16 %v1130_v36, %v1129_v35 }
 0x196   : > { %2745 = vmatmul.msk.bf16.gmra.mxu1 %vm642_vm0, %v1148_v37  ;;  %1614 = vperm.xlu1 %2878, %v3464_v15   ;;  %v1725_v15 = vsel %vm1677_vm14, 1, %v3096_v40 }
 0x197   : > { %v1089_v38 = vpop.f32.mrf.mxu0 }
 0x198   : > { %v1090_v42 = vadd.f32 %v3371_v39, %v1089_v38  ;;  %v3495_v38 = vld [vmem:[%s3411_s29 + $0x48] sm:$0xff] }
 0x199   : > { %1599 = vperm.xlu2 %2879, %v3495_v38  }
 0x19a   : > { %v1131_v46 = vmax.f32 %v1090_v42, 0.0  ;;  %v3498_v42 = vld [vmem:[%s3411_s29 + $0xa0] sm:$0xff] }
 0x19e   : > { %1623 = vperm.xlu1 %2878, %v3483_v25   ;;  %v1728_v25 = vsel %vm1680_vm2, 1, %v3096_v40 }
 0x19f   : > { %v1091_v43 = vpop.f32.mrf.mxu0 }
 0x1a0   : > { %v1092_v44 = vadd.f32 %v3371_v39, %v1091_v43  ;;  %v3501_v43 = vld [vmem:[%s3411_s29 + $0x80] sm:$0xff] }
 0x1a1   : > { %1620 = vperm.xlu0 %2880, %v3501_v43  }
 0x1a2   : > { %v1132_v47 = vmax.f32 %v1092_v44, 0.0 }
 0x1a4   : > { %v1149_v48 = vpack.c.bf16 %v1132_v47, %v1131_v46 }
 0x1a6   : > { %2746 = vmatmul.msk.bf16.gmra.mxu1 %vm642_vm0, %v1149_v48  ;;  %1632 = vperm.xlu1 %2878, %v3498_v42  }
 0x1a7   : > { %v1094_v49 = vpop.f32.mrf.mxu0 }
 0x1a8   : > { %v1095_v52 = vadd.f32 %v3371_v39, %v1094_v49 }
 0x1aa   : > { %v1133_v61 = vmax.f32 %v1095_v52, 0.0 }
 0x1af   : > { %v1096_v55 = vpop.f32.mrf.mxu0 }
 0x1b0   : > { %v1097_v56 = vadd.f32 %v3371_v39, %v1096_v55  ;;  %v3516_v55 = vld [vmem:[%s3411_s29 + $0x98] sm:$0xff] }
 0x1b1   : > { %1629 = vperm.xlu0 %2880, %v3516_v55   ;;  %vm1686_vm8 = vcmp.ge.s32.totalorder %v3516_v55, 0 }
 0x1b2   : > { %v731_v53 = vpop.f32.mrf.mxu2  ;;  %v1134_v62 = vmax.f32 %v1097_v56, 0.0 }
 0x1b3   : > { %v732_v54 = vadd.f32 %v2885_v51, %v731_v53  ;;  %v3510_v53 = vld [vmem:[%s3411_s29 + $0x60] sm:$0xff] }
 0x1b4   : > { %v1150_v1 = vpack.c.bf16 %v1134_v62, %v1133_v61  ;;  %1608 = vperm.xlu2 %2879, %v3510_v53  }
 0x1b5   : > { %v735_v57 = vmax.f32 %v732_v54, 0.0  ;;  %v3513_v54 = vld [vmem:[%s3411_s29 + $0xb8] sm:$0xff] }
 0x1b6   : > { %2747 = vmatmul.msk.bf16.gmra.mxu1 %vm642_vm0, %v1150_v1  ;;  %1641 = vperm.xlu1 %2878, %v3513_v54  }
 0x1b7   : > { %v740_v63 = vadd.f32 %v738_v60, %v735_v57  ;;  %v1099_v5 = vpop.f32.mrf.mxu0  ;;  %v1335_v57 = vpop.permute.xlu2 %1334 }
 0x1b8   : > { %v1100_v9 = vadd.f32 %v3371_v39, %v1099_v5  ;;  %v3525_v5 = vld [vmem:[%s3411_s29 + $0x78] sm:$0xff] }
 0x1b9   : > { %v741_v2 = vpack.c.bf16 %v740_v63, %v740_v63 }
 0x1ba   : > { %v733_v3 = vpop.f32.mrf.mxu2  ;;  %v1135_v17 = vmax.f32 %v1100_v9, 0.0  ;;  %v3529_v9 = vld [vmem:[%s3411_s29 + $0xb0] sm:$0xff] }
 0x1bb   : > { %v746_v4 = vsel %vm744_vm3, %v741_v2, %v745_v0  ;;  %v1333_v0 = vpop.permute.xlu1 %1332  ;;  %1638 = vperm.xlu0 %2880, %v3529_v9   ;;  %vm1687_vm3 = vcmp.ge.s32.totalorder %v3498_v42, 0 }
 0x1bc   : > { %747 = vst [vmem:[#allocation2] sm:$0x7] %v746_v4  ;;  %1617 = vperm.xlu2 %2879, %v3525_v5   ;;  %v1735_v24 = vsel %vm1687_vm3, 1, %v3096_v40 }
 0x1bf   : > { %v1101_v10 = vpop.f32.mrf.mxu0 }
 0x1c0   : > { %v1102_v12 = vadd.f32 %v3371_v39, %v1101_v10  ;;  %v1717_v10 = vsel %vm1669_vm4, 1, %v3096_v40  ;;  %vm1676_vm4 = vcmp.ge.s32.totalorder %v3495_v38, 0 }
 0x1c1   : > { %1746 = vperm.xlu1 %2878, %v1717_v10   ;;  %v1729_v10 = vsel %vm1681_vm12, 1, %v3096_v40  ;;  %v1724_v26 = vsel %vm1676_vm4, 1, %v3096_v40 }
 0x1c2   : > { %v1136_v18 = vmax.f32 %v1102_v12, 0.0 }
 0x1c3   : > { %v1436_v11 = vld [vmem:[#allocation2] sm:$0x7]  ;;  %v1220_v19 = vpop.f32.mrf.mxu1 }
 0x1c4   : > { %v1474_v13 = vsel %vm642_vm0, %v1436_v11, 0  ;;  %v1151_v20 = vpack.c.bf16 %v1136_v18, %v1135_v17  ;;  %v1221_v23 = vadd.f32 %v3475_v21, %v1220_v19  ;;  %v1337_v19 = vpop.permute.xlu2 %1336 }
 0x1c5   : > { %1483 = vmatpush.bf16.xpose.msrb.mxu2 %v1474_v13 }
 0x1c6   : > { %2748 = vmatmul.msk.bf16.gmra.mxu1 %vm642_vm0, %v1151_v20  ;;  %v1280_v28 = vmax.f32 %v1221_v23, 0.0  ;;  %v1720_v23 = vsel %vm1672_vm5, 1, %v3096_v40  ;;  %vm1683_vm5 = vcmp.ge.s32.totalorder %v3501_v43, 0 }
 0x1c7   : > { %v1104_v22 = vpop.f32.mrf.mxu0  ;;  %v1731_v42 = vsel %vm1683_vm5, 1, %v3096_v40 }
 0x1c8   : > { %v1105_v31 = vadd.f32 %v3371_v39, %v1104_v22  ;;  %v1400_v35 = vadd.f32 %v1329_v30, %v1280_v28  ;;  %v3538_v22 = vld [vmem:[%s3411_s29 + $0x90] sm:$0xff] }
 0x1c9   : > { %1626 = vperm.xlu2 %2879, %v3538_v22   ;;  %1755 = vperm.xlu1 %2878, %v1720_v23   ;;  %vm1685_vm11 = vcmp.ge.s32.totalorder %v3538_v22, 0 }
 0x1ca   : > { %v1137_v44 = vmax.f32 %v1105_v31, 0.0 }
 0x1cb   : > { %v1222_v27 = vpop.f32.mrf.mxu1 }
 0x1cc   : > { %v1223_v29 = vadd.f32 %v3475_v21, %v1222_v27  ;;  %v1716_v27 = vsel %vm1668_vm6, 1, %v3096_v40  ;;  %v1343_v31 = vpop.permute.xlu2 %1342  ;;  %vm1690_vm6 = vcmp.ge.s32.totalorder %v3513_v54, 0 }
 0x1cd   : > { %1743 = vperm.xlu0 %2880, %v1716_v27   ;;  %v1738_v38 = vsel %vm1690_vm6, 1, %v3096_v40  ;;  %vm2364_vm6 = vcmask 39936  }
 0x1ce   : > { %v1281_v32 = vmax.f32 %v1223_v29, 0.0 }
 0x1cf   : > { %v1106_v34 = vpop.f32.mrf.mxu0 }
 0x1d0   : > { %v1401_v36 = vadd.f32 %v1331_v33, %v1281_v32  ;;  %v1107_v37 = vadd.f32 %v3371_v39, %v1106_v34  ;;  %v1339_v32 = vpop.permute.xlu0 %1338  ;;  %v1341_v34 = vpop.permute.xlu1 %1340 }
 0x1d2   : > { %v1424_v46 = vpack.c.bf16 %v1401_v36, %v1400_v35  ;;  %v1138_v47 = vmax.f32 %v1107_v37, 0.0 }
 0x1d3   : > { %v1225_v48 = vpop.f32.mrf.mxu1 }
 0x1d4   : > { %v1152_v49 = vpack.c.bf16 %v1138_v47, %v1137_v44  ;;  %2752 = vmatmul.msk.bf16.vlgmr.msrb.gmra.mxu2 %vm642_vm0, %v1424_v46  ;;  %v1226_v52 = vadd.f32 %v3475_v21, %v1225_v48  ;;  %v3549_v44 = vld [vmem:[%s3411_s29 + $0xa8] sm:$0xff]  ;;  %v1723_v46 = vsel %vm1675_vm7, 1, %v3096_v40  ;;  %vm1679_vm7 = vcmp.ge.s32.totalorder %v3510_v53, 0 }
 0x1d5   : > { %1635 = vperm.xlu2 %2879, %v3549_v44   ;;  %1764 = vperm.xlu1 %2878, %v1723_v46   ;;  %v1727_v43 = vsel %vm1679_vm7, 1, %v3096_v40  ;;  %vm1688_vm12 = vcmp.ge.s32.totalorder %v3549_v44, 0 }
 0x1d6   : > { %2749 = vmatmul.msk.bf16.gmra.mxu1 %vm642_vm0, %v1152_v49  ;;  %v1282_v60 = vmax.f32 %v1226_v52, 0.0  ;;  %1752 = vperm.xlu0 %2880, %v1719_v58   ;;  %v1736_v22 = vsel %vm1688_vm12, 1, %v3096_v40 }
 0x1d7   : > { %v1109_v51 = vpop.f32.mrf.mxu0 }
 0x1d8   : > { %v1110_v62 = vadd.f32 %v3371_v39, %v1109_v51  ;;  %v1402_v2 = vadd.f32 %v1333_v0, %v1282_v60  ;;  %v1715_v60 = vsel %vm1667_vm9, 1, %v3096_v40  ;;  %vm1682_vm9 = vcmp.ge.s32.totalorder %v3525_v5, 0 }
 0x1da   : > { %v1139_v11 = vmax.f32 %v1110_v62, 0.0 }
 0x1db   : > { %v1227_v56 = vpop.f32.mrf.mxu1 }
 0x1dc   : > { %v1228_v61 = vadd.f32 %v3475_v21, %v1227_v56  ;;  %v3555_v56 = vpop.permute.xlu2 %1348 }
 0x1dd   : > { %1740 = vperm.xlu2 %2879, %v1715_v60   ;;  %v1730_v60 = vsel %vm1682_vm9, 1, %v3096_v40 }
 0x1de   : > { %v1283_v63 = vmax.f32 %v1228_v61, 0.0  ;;  %v1726_v61 = vsel %vm1678_vm10, 1, %v3096_v40  ;;  %1761 = vperm.xlu0 %2880, %v1722_v41   ;;  %vm1689_vm10 = vcmp.ge.s32.totalorder %v3529_v9, 0  ;;  %v1733_v41 = vsel %vm1685_vm11, 1, %v3096_v40 }
 0x1df   : > { %v1111_v1 = vpop.f32.mrf.mxu0  ;;  %1773 = vperm.xlu1 %2878, %v1726_v61   ;;  %v1737_v55 = vsel %vm1689_vm10, 1, %v3096_v40 }
 0x1e0   : > { %v1403_v3 = vadd.f32 %v1335_v57, %v1283_v63  ;;  %v1112_v4 = vadd.f32 %v3371_v39, %v1111_v1 }
 0x1e2   : > { %v1140_v12 = vmax.f32 %v1112_v4, 0.0  ;;  %v1425_v13 = vpack.c.bf16 %v1403_v3, %v1402_v2  ;;  %v1345_v4 = vpop.permute.xlu0 %1344 }
 0x1e3   : > { %v1230_v17 = vpop.f32.mrf.mxu1 }
 0x1e4   : > { %v1153_v18 = vpack.c.bf16 %v1140_v12, %v1139_v11  ;;  %2753 = vmatmul.msk.bf16.gmra.mxu2 %vm642_vm0, %v1425_v13  ;;  %v1231_v20 = vadd.f32 %v3475_v21, %v1230_v17  ;;  %v3566_v0 = vpop.permute.xlu2 %1354 }
 0x1e5   : > { %1749 = vperm.xlu2 %2879, %v1718_v8  }
 0x1e6   : > { %2750 = vmatmul.msk.bf16.gmra.mxu1 %vm642_vm0, %v1153_v18  ;;  %v1284_v29 = vmax.f32 %v1231_v20, 0.0  ;;  %1770 = vperm.xlu0 %2880, %v1725_v15  }
 0x1e7   : > { %v1114_v59 = vpop.f32.mrf.mxu0  ;;  %1782 = vperm.xlu1 %2878, %v1729_v10  }
 0x1e8   : > { %v1115_v33 = vadd.f32 %v3371_v39, %v1114_v59  ;;  %v1404_v35 = vadd.f32 %v1337_v19, %v1284_v29  ;;  %v1732_v59 = vsel %vm1684_vm15, 1, %v3096_v40  ;;  %vm3097_vm15 = vmmov 1  }
 0x1ea   : > { %v1141_v47 = vmax.f32 %v1115_v33, 0.0  ;;  %v1351_v19 = vpop.permute.xlu0 %1350 }
 0x1eb   : > { %v1232_v28 = vpop.f32.mrf.mxu1 }
 0x1ec   : > { %v1233_v30 = vadd.f32 %v3475_v21, %v1232_v28  ;;  %v3577_v13 = vpop.permute.xlu2 %1360 }
 0x1ed   : > { %1758 = vperm.xlu2 %2879, %v1721_v16  }
 0x1ee   : > { %v1285_v50 = vmax.f32 %v1233_v30, 0.0  ;;  %1779 = vperm.xlu0 %2880, %v1728_v25  }
 0x1ef   : > { %v1116_v6 = vpop.f32.mrf.mxu0  ;;  %1791 = vperm.xlu1 %2878, %v1732_v59  }
 0x1f0   : > { %v1405_v36 = vadd.f32 %v1339_v32, %v1285_v50  ;;  %v1117_v37 = vadd.f32 %v3371_v39, %v1116_v6  ;;  %v1347_v39 = vpop.permute.xlu1 %1346 }
 0x1f2   : > { %v1142_v48 = vmax.f32 %v1117_v37, 0.0  ;;  %v1426_v49 = vpack.c.bf16 %v1405_v36, %v1404_v35  ;;  %v3596_v32 = vpop.permute.xlu0 %1356 }
 0x1f3   : > { %v1235_v51 = vpop.f32.mrf.mxu1 }
 0x1f4   : > { %v1154_v52 = vpack.c.bf16 %v1142_v48, %v1141_v47  ;;  %2754 = vmatmul.msk.bf16.gmra.mxu2 %vm642_vm0, %v1426_v49  ;;  %v1236_v57 = vadd.f32 %v3475_v21, %v1235_v51  ;;  %v3589_v27 = vpop.permute.xlu2 %1366  ;;  %v1734_v51 = vsel %vm1686_vm8, 1, %v3096_v40 }
 0x1f5   : > { %1767 = vperm.xlu2 %2879, %v1724_v26  }
 0x1f6   : > { %2751 = vmatmul.msk.bf16.gmra.mxu1 %vm642_vm0, %v1154_v52  ;;  %v1286_v63 = vmax.f32 %v1236_v57, 0.0  ;;  %1788 = vperm.xlu0 %2880, %v1731_v42  }
 0x1f7   : > { %1800 = vperm.xlu1 %2878, %v1735_v24  }
 0x1f8   : > { %v3569_v2 = vpop.permute.xlu1 %1352  ;;  %v1406_v7 = vadd.f32 %v1341_v34, %v1286_v63 }
 0x1fa   : > { %v3610_v36 = vpop.permute.xlu0 %1362 }
 0x1fb   : > { %v1237_v62 = vpop.f32.mrf.mxu1 }
 0x1fc   : > { %v1238_v14 = vadd.f32 %v3475_v21, %v1237_v62  ;;  %v3602_v34 = vpop.permute.xlu2 %1372 }
 0x1fd   : > { %1776 = vperm.xlu2 %2879, %v1727_v43  }
 0x1fe   : > { %v1287_v1 = vmax.f32 %v1238_v14, 0.0  ;;  %1797 = vperm.xlu0 %2880, %v1734_v51  }
 0x1ff   : > { %1809 = vperm.xlu1 %2878, %v1738_v38  }
 0x200   : > { %v1407_v3 = vadd.f32 %v1343_v31, %v1287_v1  ;;  %v3580_v17 = vpop.permute.xlu1 %1358 }
 0x202   : > { %v1427_v11 = vpack.c.bf16 %v1407_v3, %v1406_v7  ;;  %v3623_v58 = vpop.permute.xlu0 %1368 }
 0x203   : > { %v1240_v12 = vpop.f32.mrf.mxu1 }
 0x204   : > { %2755 = vmatmul.msk.bf16.gmra.mxu2 %vm642_vm0, %v1427_v11  ;;  %v1241_v18 = vadd.f32 %v3475_v21, %v1240_v12  ;;  %v3616_v49 = vpop.permute.xlu2 %1575 }
 0x205   : > { %1785 = vperm.xlu2 %2879, %v1730_v60  }
 0x206   : > { %v1288_v20 = vmax.f32 %v1241_v18, 0.0  ;;  %1806 = vperm.xlu0 %2880, %v1737_v55  }
 0x208   : > { %v3592_v29 = vpop.permute.xlu1 %1364  ;;  %v1408_v30 = vadd.f32 %v1345_v4, %v1288_v20 }
 0x20a   : > { %v3633_v62 = vpop.permute.xlu0 %1374 }
 0x20b   : > { %v1242_v45 = vpop.f32.mrf.mxu1 }
 0x20c   : > { %v1243_v23 = vadd.f32 %v3475_v21, %v1242_v45 }
 0x20d   : > { %1794 = vperm.xlu2 %2879, %v1733_v41  }
 0x20e   : > { %v1289_v28 = vmax.f32 %v1243_v23, 0.0 }
 0x210   : > { %v1409_v31 = vadd.f32 %v1347_v39, %v1289_v28  ;;  %v3605_v6 = vpop.permute.xlu1 %1370 }
 0x212   : > { %v1428_v33 = vpack.c.bf16 %v1409_v31, %v1408_v30  ;;  %v3642_v4 = vpop.permute.xlu0 %1578 }
 0x213   : > { %v1245_v50 = vpop.f32.mrf.mxu1 }
 0x214   : > { %2756 = vmatmul.msk.bf16.gmra.mxu2 %vm642_vm0, %v1428_v33  ;;  %v1246_v35 = vadd.f32 %v3475_v21, %v1245_v50 }
 0x215   : > { %1803 = vperm.xlu2 %2879, %v1736_v22  }
 0x216   : > { %v1290_v46 = vmax.f32 %v1246_v35, 0.0 }
 0x218   : > { %v3619_v54 = vpop.permute.xlu1 %1572  ;;  %v1410_v52 = vadd.f32 %v3555_v56, %v1290_v46  ;;  %v3631_v56 = vpop.permute.xlu2 %1584 }
 0x21a   : > { %v3652_v18 = vpop.permute.xlu0 %1593 }
 0x21b   : > { %v1247_v37 = vpop.f32.mrf.mxu1 }
 0x21c   : > { %v1248_v47 = vadd.f32 %v3475_v21, %v1247_v37 }
 0x21e   : > { %v1291_v48 = vmax.f32 %v1248_v47, 0.0 }
 0x220   : > { %v1411_v39 = vadd.f32 %v1351_v19, %v1291_v48  ;;  %v3635_v63 = vpop.permute.xlu1 %1581  ;;  %v3644_v11 = vpop.permute.xlu2 %1590 }
 0x222   : > { %v1429_v57 = vpack.c.bf16 %v1411_v39, %v1410_v52  ;;  %v3662_v28 = vpop.permute.xlu0 %1602 }
 0x223   : > { %v1250_v53 = vpop.f32.mrf.mxu1 }
 0x224   : > { %2757 = vmatmul.msk.bf16.gmra.mxu2 %vm642_vm0, %v1429_v57  ;;  %v1251_v61 = vadd.f32 %v3475_v21, %v1250_v53 }
 0x226   : > { %v1292_v1 = vmax.f32 %v1251_v61, 0.0 }
 0x228   : > { %v1412_v7 = vadd.f32 %v3569_v2, %v1292_v1  ;;  %v3646_v8 = vpop.permute.xlu1 %1587  ;;  %v3655_v59 = vpop.permute.xlu2 %1599 }
 0x22b   : > { %v1252_v14 = vpop.f32.mrf.mxu1 }
 0x22c   : > { %v1253_v5 = vadd.f32 %v3475_v21, %v1252_v14 }
 0x22e   : > { %v1293_v9 = vmax.f32 %v1253_v5, 0.0 }
 0x230   : > { %v1413_v3 = vadd.f32 %v3566_v0, %v1293_v9  ;;  %v3657_v45 = vpop.permute.xlu1 %1596  ;;  %v3664_v25 = vpop.permute.xlu2 %1608 }
 0x232   : > { %v1430_v10 = vpack.c.bf16 %v1413_v3, %v1412_v7 }
 0x233   : > { %v1255_v12 = vpop.f32.mrf.mxu1 }
 0x234   : > { %2758 = vmatmul.msk.bf16.gmra.mxu2 %vm642_vm0, %v1430_v10  ;;  %v1256_v15 = vadd.f32 %v3475_v21, %v1255_v12 }
 0x236   : > { %v1294_v0 = vmax.f32 %v1256_v15, 0.0  ;;  %v1569_v15 = vlaneseq }
 0x238   : > { %v1414_v23 = vadd.f32 %v3596_v32, %v1294_v0  ;;  %v3666_v30 = vpop.permute.xlu1 %1605  ;;  %v3670_v32 = vpop.permute.xlu0 %1611 }
 0x239   : > { %v3674_v35 = vpop.permute.xlu2 %1617 }
 0x23b   : > { %v1257_v2 = vpop.f32.mrf.mxu1 }
 0x23c   : > { %v1258_v19 = vadd.f32 %v3475_v21, %v1257_v2 }
 0x23e   : > { %v1295_v20 = vmax.f32 %v1258_v19, 0.0 }
 0x240   : > { %v1415_v44 = vadd.f32 %v3580_v17, %v1295_v20  ;;  %v3676_v38 = vpop.permute.xlu1 %1614  ;;  %v3683_v51 = vpop.permute.xlu0 %1620 }
 0x242   : > { %v1431_v16 = vpack.c.bf16 %v1415_v44, %v1414_v23  ;;  %v3706_v23 = vand.u32 127, %v1569_v15 }
 0x243   : > { %v1260_v40 = vpop.f32.mrf.mxu1 }
 0x244   : > { %2759 = vmatmul.msk.bf16.gmra.mxu2 %vm642_vm0, %v1431_v16  ;;  %v1261_v31 = vadd.f32 %v3475_v21, %v1260_v40  ;;  %vm1643_vm13 = vcmp.eq.s32.totalorder %v3619_v54, %v3706_v23  ;;  %vm1644_vm4 = vcmp.eq.s32.totalorder %v3616_v49, %v3706_v23  ;;  %vm1645_vm8 = vcmp.eq.s32.totalorder %v3642_v4, %v3706_v23 }
 0x245   : > { %vm1691_vm1 = vmxor %vm1643_vm13, %vm3097_vm15 }
 0x246   : > { %v1296_v33 = vmax.f32 %v1261_v31, 0.0  ;;  %vm3748_vm7 = vmxor %vm1644_vm4, %vm3097_vm15 }
 0x248   : > { %v1416_v17 = vadd.f32 %v3577_v13, %v1296_v33  ;;  %v3685_v13 = vpop.permute.xlu2 %1626  ;;  %v3687_v39 = vpop.permute.xlu1 %1623 }
 0x249   : > { %v3695_v3 = vpop.permute.xlu0 %1629 }
 0x24b   : > { %v1262_v24 = vpop.f32.mrf.mxu1 }
 0x24c   : > { %v1263_v50 = vadd.f32 %v3475_v21, %v1262_v24 }
 0x24e   : > { %v1297_v26 = vmax.f32 %v1263_v50, 0.0 }
 0x250   : > { %v1417_v42 = vadd.f32 %v3610_v36, %v1297_v26  ;;  %v3698_v22 = vpop.permute.xlu2 %1635  ;;  %v3700_v19 = vpop.permute.xlu1 %1632 }
 0x252   : > { %v1432_v37 = vpack.c.bf16 %v1417_v42, %v1416_v17 }
 0x253   : > { %v1265_v46 = vpop.f32.mrf.mxu1 }
 0x254   : > { %2760 = vmatmul.msk.bf16.gmra.mxu2 %vm642_vm0, %v1432_v37  ;;  %v1266_v43 = vadd.f32 %v3475_v21, %v1265_v46 }
 0x256   : > { %v1298_v57 = vmax.f32 %v1266_v43, 0.0  ;;  %v3712_v43 = vpop.permute.xlu0 %1638 }
 0x257   : > { %v3679_v47 = vpop.f32.mrf.mxu2 }
 0x258   : > { %v1907_v48 = vand.u32 2147483647, %v3679_v47  ;;  %v1418_v14 = vadd.f32 %v3592_v29, %v1298_v57  ;;  %v1859_v40 = vsub.f32 0.0, %v3679_v47  ;;  %v1741_v57 = vpop.permute.xlu2 %1740 }
 0x259   : > { %vm1811_vm2 = vcmp.eq.s32.totalorder %v1741_v57, 1 }
 0x25a   : > { %v1931_v52 = vsub.f32 0.0, %v1907_v48  ;;  %vm3727_vm3 = vmand %vm1811_vm2, %vm1691_vm1  ;;  %vm1646_vm1 = vcmp.eq.s32.totalorder %v3635_v63, %v3706_v23 }
 0x25b   : > { %v1267_v36 = vpop.f32.mrf.mxu1 }
 0x25c   : > { %v1955_v53 = vmul.f32 1.442695, %v1931_v52  ;;  %v1268_v60 = vadd.f32 %v3475_v21, %v1267_v36 }
 0x25e   : > { %2887 = vpow2.f32 %v1955_v53  ;;  %v1299_v55 = vmax.f32 %v1268_v60, 0.0  ;;  %v1883_v53 = vmax.f32 %v1859_v40, 0.0  ;;  %v3714_v60 = vpop.permute.xlu1 %1641 }
 0x25f   : > { %v3690_v61 = vpop.f32.mrf.mxu2 }
 0x260   : > { %v1419_v1 = vadd.f32 %v3589_v27, %v1299_v55  ;;  %v1908_v5 = vand.u32 2147483647, %v3690_v61 }
 0x262   : > { %v1932_v41 = vsub.f32 0.0, %v1908_v5  ;;  %v1433_v9 = vpack.c.bf16 %v1419_v1, %v1418_v14 }
 0x263   : > { %v1270_v7 = vpop.f32.mrf.mxu1 }
 0x264   : > { %v2888_v10 = vpop.eup %2887  ;;  %v1957_v12 = vmul.f32 1.442695, %v1932_v41  ;;  %2761 = vmatmul.msk.bf16.gmra.mxu2 %vm642_vm0, %v1433_v9  ;;  %v1271_v29 = vadd.f32 %v3475_v21, %v1270_v7 }
 0x265   : > { %v2003_v2 = vadd.f32 1.0, %v2888_v10  ;;  %v2006_v0 = vmul.f32 -0.5, %v2888_v10  ;;  %v2009_v31 = vand.u32 2147483647, %v2888_v10 }
 0x266   : > { %2889 = vpow2.f32 %v1957_v12  ;;  %v1300_v50 = vmax.f32 %v1271_v29, 0.0 }
 0x267   : > { %2891 = vlog2.f32 %v2003_v2  ;;  %v3702_v27 = vpop.f32.mrf.mxu2  ;;  %v2007_v44 = vadd.f32 1.0, %v2006_v0  ;;  %vm2010_vm14 = vcmp.lt.f32.partialorder %v2009_v31, 0.0004427343 }
 0x268   : > { %v1909_v20 = vand.u32 2147483647, %v3702_v27  ;;  %v1420_v1 = vadd.f32 %v3623_v58, %v1300_v50  ;;  %v1860_v58 = vsub.f32 0.0, %v3690_v61 }
 0x269   : > { %v2008_v37 = vmul.f32 %v2888_v10, %v2007_v44 }
 0x26a   : > { %v1933_v16 = vsub.f32 0.0, %v1909_v20 }
 0x26b   : > { %v1272_v24 = vpop.f32.mrf.mxu1 }
 0x26c   : > { %v2890_v33 = vpop.eup %2889  ;;  %v1959_v26 = vmul.f32 1.442695, %v1933_v16  ;;  %v1273_v17 = vadd.f32 %v3475_v21, %v1272_v24 }
 0x26d   : > { %v2892_v42 = vpop.eup %2891  ;;  %v2012_v46 = vadd.f32 1.0, %v2890_v33  ;;  %v2015_v52 = vmul.f32 -0.5, %v2890_v33  ;;  %v2018_v0 = vand.u32 2147483647, %v2890_v33 }
 0x26e   : > { %v2005_v48 = vmul.f32 0.6931472, %v2892_v42  ;;  %2893 = vpow2.f32 %v1959_v26  ;;  %v1301_v36 = vmax.f32 %v1273_v17, 0.0  ;;  %v1884_v17 = vmax.f32 %v1860_v58, 0.0 }
 0x26f   : > { %2895 = vlog2.f32 %v2012_v46  ;;  %v3716_v55 = vpop.f32.mrf.mxu2  ;;  %v2016_v7 = vadd.f32 1.0, %v2015_v52  ;;  %vm2019_vm5 = vcmp.lt.f32.partialorder %v2018_v0, 0.0004427343  ;;  %v1744_v46 = vpop.permute.xlu0 %1743 }
 0x270   : > { %v2011_v14 = vsel %vm2010_vm14, %v2008_v37, %v2005_v48  ;;  %v1421_v5 = vadd.f32 %v3605_v6, %v1301_v36  ;;  %v1910_v41 = vand.u32 2147483647, %v3716_v55  ;;  %v1861_v48 = vsub.f32 0.0, %v3702_v27 }
 0x271   : > { %v2219_v9 = vadd.f32 %v2011_v14, %v1883_v53  ;;  %v2017_v26 = vmul.f32 %v2890_v33, %v2016_v7  ;;  %v1747_v53 = vpop.permute.xlu1 %1746  ;;  %vm1812_vm10 = vcmp.eq.s32.totalorder %v1744_v46, 1 }
 0x272   : > { %v1934_v10 = vsub.f32 0.0, %v1910_v41  ;;  %v1434_v12 = vpack.c.bf16 %v1421_v5, %v1420_v1  ;;  %vm1813_vm9 = vcmp.eq.s32.totalorder %v1747_v53, 1  ;;  %vm3763_vm11 = vmand %vm1812_vm10, %vm3748_vm7  ;;  %vm1648_vm10 = vcmp.eq.s32.totalorder %v3646_v8, %v3706_v23 }
 0x273   : > { %v2243_v15 = vsub.f32 0.6931472, %v2219_v9  ;;  %v2291_v2 = vadd.f32 %v2219_v9, %v3679_v47  ;;  %v1275_v6 = vpop.f32.mrf.mxu1 }
 0x274   : > { %v2894_v29 = vpop.eup %2893  ;;  %v1961_v20 = vmul.f32 1.442695, %v1934_v10  ;;  %2762 = vmatmul.msk.bf16.gmra.mxu2 %vm642_vm0, %v1434_v12  ;;  %v1276_v52 = vadd.f32 %v3475_v21, %v1275_v6 }
 0x275   : > { %v2896_v16 = vpop.eup %2895  ;;  %v2267_v40 = vsel %vm1643_vm13, %v2243_v15, 0.0  ;;  %v2764_v31 = vadd.f32 -0.6931472, %v2291_v2  ;;  %v2021_v24 = vadd.f32 1.0, %v2894_v29  ;;  %v2024_v47 = vmul.f32 -0.5, %v2894_v29  ;;  %vm1693_vm13 = vmxor %vm1645_vm8, %vm3097_vm15 }
 0x276   : > { %v2014_v50 = vmul.f32 0.6931472, %v2896_v16  ;;  %2897 = vpow2.f32 %v1961_v20  ;;  %v2027_v41 = vand.u32 2147483647, %v2894_v29  ;;  %v2365_v12 = vsel %vm2364_vm6, %v2267_v40, 0.0  ;;  %vm3784_vm14 = vmand %vm1813_vm9, %vm1693_vm13 }
 0x277   : > { %2899 = vlog2.f32 %v2021_v24  ;;  %v2339_v42 = vsel %vm3727_vm3, %v2764_v31, 0.0  ;;  %v3739_v37 = vpop.f32.mrf.mxu2  ;;  %v2025_v57 = vadd.f32 1.0, %v2024_v47  ;;  %v1885_v15 = vmax.f32 %v1861_v48, 0.0  ;;  %vm1694_vm3 = vmxor %vm1646_vm1, %vm3097_vm15 }
 0x278   : > { %v2020_v54 = vsel %vm2019_vm5, %v2017_v26, %v2014_v50  ;;  %v1911_v33 = vand.u32 2147483647, %v3739_v37  ;;  %v1302_v2 = vmax.f32 %v1276_v52, 0.0  ;;  %vm2028_vm12 = vcmp.lt.f32.partialorder %v2027_v41, 0.0004427343 }
 0x279   : > { %v2220_v36 = vadd.f32 %v2020_v54, %v1884_v17  ;;  %v2026_v44 = vmul.f32 %v2894_v29, %v2025_v57  ;;  %v2422_v48 = vsel %vm2364_vm6, %v2339_v42, 0.0  ;;  %vm1647_vm5 = vcmp.eq.s32.totalorder %v3631_v56, %v3706_v23 }
 0x27a   : > { %v1935_v9 = vsub.f32 0.0, %v1911_v33  ;;  %v1422_v26 = vadd.f32 %v3602_v34, %v1302_v2 }
 0x27b   : > { %v2244_v1 = vsub.f32 0.6931472, %v2220_v36  ;;  %v2292_v5 = vadd.f32 %v2220_v36, %v3690_v61  ;;  %v1277_v7 = vpop.f32.mrf.mxu1 }
 0x27c   : > { %v2898_v10 = vpop.eup %2897  ;;  %v1278_v58 = vadd.f32 %v3475_v21, %v1277_v7  ;;  %v1963_v49 = vmul.f32 1.442695, %v1935_v9 }
 0x27d   : > { %v2900_v0 = vpop.eup %2899  ;;  %v2268_v6 = vsel %vm1644_vm4, %v2244_v1, 0.0  ;;  %v2765_v20 = vadd.f32 -0.6931472, %v2292_v5  ;;  %v2030_v16 = vadd.f32 1.0, %v2898_v10  ;;  %v2033_v24 = vmul.f32 -0.5, %v2898_v10 }
 0x27e   : > { %v2366_v40 = vsel %vm2364_vm6, %v2268_v6, 0.0  ;;  %v2023_v31 = vmul.f32 0.6931472, %v2900_v0  ;;  %v1303_v21 = vmax.f32 %v1278_v58, 0.0  ;;  %v1862_v1 = vsub.f32 0.0, %v3716_v55 }
 0x27f   : > { %v2367_v47 = vadd.f32 %v2366_v40, %v2365_v12  ;;  %2901 = vlog2.f32 %v2030_v16  ;;  %v3768_v50 = vpop.f32.mrf.mxu2  ;;  %v2340_v46 = vsel %vm3763_vm11, %v2765_v20, 0.0  ;;  %v2034_v36 = vadd.f32 1.0, %v2033_v24 }
 0x280   : > { %v2029_v29 = vsel %vm2028_vm12, %v2026_v44, %v2023_v31  ;;  %v1423_v17 = vadd.f32 %v3633_v62, %v1303_v21  ;;  %2903 = vpow2.f32 %v1963_v49  ;;  %v2423_v52 = vsel %vm2364_vm6, %v2340_v46, 0.0  ;;  %v1750_v44 = vpop.permute.xlu2 %1749 }
 0x281   : > { %v2221_v54 = vadd.f32 %v2029_v29, %v1885_v15  ;;  %v2424_v33 = vadd.f32 %v2423_v52, %v2422_v48  ;;  %v1912_v34 = vand.u32 2147483647, %v3768_v50  ;;  %v2036_v5 = vand.u32 2147483647, %v2898_v10 }
 0x282   : > { %v1435_v57 = vpack.c.bf16 %v1423_v17, %v1422_v26  ;;  %v2035_v53 = vmul.f32 %v2898_v10, %v2034_v36  ;;  %v1886_v6 = vmax.f32 %v1862_v1, 0.0  ;;  %v1863_v52 = vsub.f32 0.0, %v3739_v37 }
 0x283   : > { %v2245_v62 = vsub.f32 0.6931472, %v2221_v54  ;;  %v2293_v14 = vadd.f32 %v2221_v54, %v3702_v27  ;;  %v1936_v42 = vsub.f32 0.0, %v1912_v34  ;;  %vm2037_vm2 = vcmp.lt.f32.partialorder %v2036_v5, 0.0004427343 }
 0x284   : > { %2763 = vmatmul.msk.bf16.gmra.mxu2 %vm642_vm0, %v1435_v57  ;;  %vm1814_vm0 = vcmp.eq.s32.totalorder %v1750_v44, 1 }
 0x285   : > { %v2902_v9 = vpop.eup %2901  ;;  %v2269_v7 = vsel %vm1645_vm8, %v2245_v62, 0.0  ;;  %v2766_v27 = vadd.f32 -0.6931472, %v2293_v14  ;;  %v1965_v2 = vmul.f32 1.442695, %v1936_v42  ;;  %vm3806_vm4 = vmand %vm1814_vm0, %vm1694_vm3 }
 0x286   : > { %v2368_v12 = vsel %vm2364_vm6, %v2269_v7, 0.0  ;;  %v2032_v15 = vmul.f32 0.6931472, %v2902_v9  ;;  %v2904_v58 = vpop.eup %2903  ;;  %v1887_v7 = vmax.f32 %v1863_v52, 0.0  ;;  %vm1695_vm8 = vmxor %vm1647_vm5, %vm3097_vm15 }
 0x287   : > { %v2369_v0 = vadd.f32 %v2368_v12, %v2367_v47  ;;  %v2341_v20 = vsel %vm3784_vm14, %v2766_v27, 0.0  ;;  %v3797_v16 = vpop.f32.mrf.mxu2  ;;  %v2039_v40 = vadd.f32 1.0, %v2904_v58  ;;  %v2042_v31 = vmul.f32 -0.5, %v2904_v58  ;;  %vm1696_vm14 = vmxor %vm1648_vm10, %vm3097_vm15 }
 0x288   : > { %v2038_v61 = vsel %vm2037_vm2, %v2035_v53, %v2032_v15  ;;  %v2425_v4 = vsel %vm2364_vm6, %v2341_v20, 0.0  ;;  %2905 = vpow2.f32 %v1965_v2  ;;  %v1913_v21 = vand.u32 2147483647, %v3797_v16  ;;  %v1753_v53 = vpop.permute.xlu0 %1752 }
 0x289   : > { %v2222_v10 = vadd.f32 %v2038_v61, %v1886_v6  ;;  %v2426_v24 = vadd.f32 %v2425_v4, %v2424_v33  ;;  %2907 = vlog2.f32 %v2039_v40  ;;  %v2043_v54 = vadd.f32 1.0, %v2042_v31 }
 0x28a   : > { %v1937_v26 = vsub.f32 0.0, %v1913_v21  ;;  %v2045_v36 = vand.u32 2147483647, %v2904_v58  ;;  %v1864_v15 = vsub.f32 0.0, %v3768_v50  ;;  %vm1815_vm9 = vcmp.eq.s32.totalorder %v1753_v53, 1 }
 0x28b   : > { %v2246_v47 = vsub.f32 0.6931472, %v2222_v10  ;;  %v2294_v49 = vadd.f32 %v2222_v10, %v3716_v55  ;;  %v2044_v42 = vmul.f32 %v2904_v58, %v2043_v54  ;;  %vm3831_vm11 = vmand %vm1815_vm9, %vm1695_vm8  ;;  %v1756_v54 = vpop.permute.xlu1 %1755 }
 0x28c   : > { %v1967_v57 = vmul.f32 1.442695, %v1937_v26  ;;  %vm2046_vm7 = vcmp.lt.f32.partialorder %v2045_v36, 0.0004427343  ;;  %v1888_v40 = vmax.f32 %v1864_v15, 0.0  ;;  %vm1816_vm13 = vcmp.eq.s32.totalorder %v1756_v54, 1 }
 0x28d   : > { %v2270_v17 = vsel %vm1646_vm1, %v2246_v47, 0.0  ;;  %v2767_v46 = vadd.f32 -0.6931472, %v2294_v49  ;;  %vm1649_vm1 = vcmp.eq.s32.totalorder %v3644_v11, %v3706_v23  ;;  %vm3853_vm2 = vmand %vm1816_vm13, %vm1696_vm14  ;;  %vm1652_vm14 = vcmp.eq.s32.totalorder %v3655_v59, %v3706_v23 }
 0x28e   : > { %v2370_v48 = vsel %vm2364_vm6, %v2270_v17, 0.0  ;;  %v2906_v33 = vpop.eup %2905  ;;  %2909 = vpow2.f32 %v1967_v57  ;;  %v1865_v57 = vsub.f32 0.0, %v3797_v16  ;;  %vm1697_vm3 = vmxor %vm1649_vm1, %vm3097_vm15 }
 0x28f   : > { %v2371_v34 = vadd.f32 %v2370_v48, %v2369_v0  ;;  %v2342_v55 = vsel %vm3806_vm4, %v2767_v46, 0.0  ;;  %v3817_v62 = vpop.f32.mrf.mxu2  ;;  %v2908_v14 = vpop.eup %2907  ;;  %v2048_v63 = vadd.f32 1.0, %v2906_v33  ;;  %v2051_v1 = vmul.f32 -0.5, %v2906_v33 }
 0x290   : > { %v2427_v5 = vsel %vm2364_vm6, %v2342_v55, 0.0  ;;  %v2041_v41 = vmul.f32 0.6931472, %v2908_v14  ;;  %v1914_v27 = vand.u32 2147483647, %v3817_v62  ;;  %v1889_v15 = vmax.f32 %v1865_v57, 0.0 }
 0x291   : > { %v2428_v9 = vadd.f32 %v2427_v5, %v2426_v24  ;;  %2911 = vlog2.f32 %v2048_v63  ;;  %v2052_v0 = vadd.f32 1.0, %v2051_v1  ;;  %v2054_v44 = vand.u32 2147483647, %v2906_v33 }
 0x292   : > { %v2047_v12 = vsel %vm2046_vm7, %v2044_v42, %v2041_v41  ;;  %v1938_v58 = vsub.f32 0.0, %v1914_v27 }
 0x293   : > { %v2223_v2 = vadd.f32 %v2047_v12, %v1887_v7  ;;  %vm2055_vm12 = vcmp.lt.f32.partialorder %v2054_v44, 0.0004427343 }
 0x294   : > { %v1969_v61 = vmul.f32 1.442695, %v1938_v58  ;;  %v2910_v4 = vpop.eup %2909 }
 0x295   : > { %v2247_v6 = vsub.f32 0.6931472, %v2223_v2  ;;  %v2295_v20 = vadd.f32 %v2223_v2, %v3739_v37  ;;  %v2053_v37 = vmul.f32 %v2906_v33, %v2052_v0  ;;  %v2057_v49 = vadd.f32 1.0, %v2910_v4 }
 0x296   : > { %v2060_v17 = vmul.f32 -0.5, %v2910_v4  ;;  %2913 = vpow2.f32 %v1969_v61  ;;  %v2063_v1 = vand.u32 2147483647, %v2910_v4 }
 0x297   : > { %v3835_v31 = vpop.f32.mrf.mxu2  ;;  %v2912_v24 = vpop.eup %2911  ;;  %v2271_v21 = vsel %vm1647_vm5, %v2247_v6, 0.0  ;;  %v2768_v47 = vadd.f32 -0.6931472, %v2295_v20  ;;  %2915 = vlog2.f32 %v2057_v49  ;;  %vm1650_vm5 = vcmp.eq.s32.totalorder %v3652_v18, %v3706_v23 }
 0x298   : > { %v2372_v29 = vsel %vm2364_vm6, %v2271_v21, 0.0  ;;  %v2050_v26 = vmul.f32 0.6931472, %v2912_v24  ;;  %v2061_v55 = vadd.f32 1.0, %v2060_v17  ;;  %vm2064_vm0 = vcmp.lt.f32.partialorder %v2063_v1, 0.0004427343  ;;  %vm1698_vm9 = vmxor %vm1650_vm5, %vm3097_vm15 }
 0x299   : > { %v2373_v46 = vadd.f32 %v2372_v29, %v2371_v34  ;;  %v2343_v48 = vsel %vm3831_vm11, %v2768_v47, 0.0  ;;  %v1915_v34 = vand.u32 2147483647, %v3835_v31  ;;  %v1866_v24 = vsub.f32 0.0, %v3817_v62 }
 0x29a   : > { %v2056_v52 = vsel %vm2055_vm12, %v2053_v37, %v2050_v26  ;;  %v2429_v56 = vsel %vm2364_vm6, %v2343_v48, 0.0  ;;  %v2062_v0 = vmul.f32 %v2910_v4, %v2061_v55  ;;  %vm1651_vm12 = vcmp.eq.s32.totalorder %v3657_v45, %v3706_v23 }
 0x29b   : > { %v2224_v36 = vadd.f32 %v2056_v52, %v1888_v40  ;;  %v2430_v33 = vadd.f32 %v2429_v56, %v2428_v9  ;;  %v1939_v42 = vsub.f32 0.0, %v1915_v34  ;;  %v1759_v40 = vpop.permute.xlu2 %1758  ;;  %v1890_v56 = vmax.f32 %v1866_v24, 0.0 }
 0x29c   : > { %v2914_v5 = vpop.eup %2913  ;;  %vm1817_vm4 = vcmp.eq.s32.totalorder %v1759_v40, 1 }
 0x29d   : > { %v2248_v14 = vsub.f32 0.6931472, %v2224_v36  ;;  %v2296_v63 = vadd.f32 %v2224_v36, %v3768_v50  ;;  %v2916_v27 = vpop.eup %2915  ;;  %v2066_v50 = vadd.f32 1.0, %v2914_v5  ;;  %v2069_v58 = vmul.f32 -0.5, %v2914_v5  ;;  %vm3875_vm7 = vmand %vm1817_vm4, %vm1697_vm3 }
 0x29e   : > { %v2059_v2 = vmul.f32 0.6931472, %v2916_v27  ;;  %v1971_v8 = vmul.f32 1.442695, %v1939_v42  ;;  %v2072_v29 = vand.u32 2147483647, %v2914_v5  ;;  %v1762_v42 = vpop.permute.xlu0 %1761 }
 0x29f   : > { %v3857_v7 = vpop.f32.mrf.mxu2  ;;  %v2272_v9 = vsel %vm1648_vm10, %v2248_v14, 0.0  ;;  %v2769_v12 = vadd.f32 -0.6931472, %v2296_v63  ;;  %2917 = vlog2.f32 %v2066_v50  ;;  %v2070_v21 = vadd.f32 1.0, %v2069_v58 }
 0x2a0   : > { %v2374_v53 = vsel %vm2364_vm6, %v2272_v9, 0.0  ;;  %v2065_v61 = vsel %vm2064_vm0, %v2062_v0, %v2059_v2  ;;  %2919 = vpow2.f32 %v1971_v8  ;;  %v1916_v47 = vand.u32 2147483647, %v3857_v7 }
 0x2a1   : > { %v2344_v6 = vsel %vm3853_vm2, %v2769_v12, 0.0  ;;  %v2375_v20 = vadd.f32 %v2374_v53, %v2373_v46  ;;  %v2225_v10 = vadd.f32 %v2065_v61, %v1889_v15  ;;  %vm2073_vm8 = vcmp.lt.f32.partialorder %v2072_v29, 0.0004427343  ;;  %vm1699_vm2 = vmxor %vm1651_vm12, %vm3097_vm15 }
 0x2a2   : > { %v2431_v44 = vsel %vm2364_vm6, %v2344_v6, 0.0  ;;  %v1940_v17 = vsub.f32 0.0, %v1916_v47  ;;  %vm1818_vm10 = vcmp.eq.s32.totalorder %v1762_v42, 1 }
 0x2a3   : > { %v2432_v4 = vadd.f32 %v2431_v44, %v2430_v33  ;;  %v2249_v37 = vsub.f32 0.6931472, %v2225_v10  ;;  %v2297_v49 = vadd.f32 %v2225_v10, %v3797_v16  ;;  %v2071_v33 = vmul.f32 %v2914_v5, %v2070_v21  ;;  %vm1842_vm11 = vmand %vm1818_vm10, %vm1698_vm9 }
 0x2a4   : > { %v1973_v34 = vmul.f32 1.442695, %v1940_v17  ;;  %v1867_v44 = vsub.f32 0.0, %v3835_v31 }
 0x2a5   : > { %v2918_v54 = vpop.eup %2917  ;;  %v2273_v48 = vsel %vm1649_vm1, %v2249_v37, 0.0  ;;  %v2770_v52 = vadd.f32 -0.6931472, %v2297_v49 }
 0x2a6   : > { %v2376_v36 = vsel %vm2364_vm6, %v2273_v48, 0.0  ;;  %v2068_v57 = vmul.f32 0.6931472, %v2918_v54  ;;  %v2920_v1 = vpop.eup %2919  ;;  %2921 = vpow2.f32 %v1973_v34  ;;  %v1891_v54 = vmax.f32 %v1867_v44, 0.0 }
 0x2a7   : > { %v3879_v46 = vpop.f32.mrf.mxu2  ;;  %v2377_v55 = vadd.f32 %v2376_v36, %v2375_v20  ;;  %v2345_v14 = vsel %vm3875_vm7, %v2770_v52, 0.0  ;;  %v2075_v9 = vadd.f32 1.0, %v2920_v1  ;;  %v2078_v12 = vmul.f32 -0.5, %v2920_v1  ;;  %vm1700_vm7 = vmxor %vm1652_vm14, %vm3097_vm15 }
 0x2a8   : > { %v1917_v16 = vand.u32 2147483647, %v3879_v46  ;;  %v2433_v41 = vsel %vm2364_vm6, %v2345_v14, 0.0  ;;  %v2074_v11 = vsel %vm2073_vm8, %v2071_v33, %v2068_v57  ;;  %v2081_v10 = vand.u32 2147483647, %v2920_v1  ;;  %v1765_v33 = vpop.permute.xlu1 %1764 }
 0x2a9   : > { %v2226_v27 = vadd.f32 %v2074_v11, %v1890_v56  ;;  %v2434_v5 = vadd.f32 %v2433_v41, %v2432_v4  ;;  %2923 = vlog2.f32 %v2075_v9  ;;  %v2079_v61 = vadd.f32 1.0, %v2078_v12 }
 0x2aa   : > { %v1941_v63 = vsub.f32 0.0, %v1917_v16  ;;  %vm2082_vm13 = vcmp.lt.f32.partialorder %v2081_v10, 0.0004427343  ;;  %v1868_v48 = vsub.f32 0.0, %v3857_v7  ;;  %v1869_v14 = vsub.f32 0.0, %v3879_v46 }
 0x2ab   : > { %v2250_v50 = vsub.f32 0.6931472, %v2226_v27  ;;  %v2298_v53 = vadd.f32 %v2226_v27, %v3817_v62  ;;  %v2080_v26 = vmul.f32 %v2920_v1, %v2079_v61  ;;  %vm1819_vm1 = vcmp.eq.s32.totalorder %v1765_v33, 1 }
 0x2ac   : > { %v1975_v15 = vmul.f32 1.442695, %v1941_v63  ;;  %v2922_v6 = vpop.eup %2921  ;;  %v1768_v63 = vpop.permute.xlu2 %1767  ;;  %vm1843_vm4 = vmand %vm1819_vm1, %vm1699_vm2  ;;  %vm1653_vm8 = vcmp.eq.s32.totalorder %v3662_v28, %v3706_v23 }
 0x2ad   : > { %v2274_v0 = vsel %vm1650_vm5, %v2250_v50, 0.0  ;;  %v2771_v58 = vadd.f32 -0.6931472, %v2298_v53  ;;  %v2084_v4 = vadd.f32 1.0, %v2922_v6  ;;  %v2087_v21 = vmul.f32 -0.5, %v2922_v6 }
 0x2ae   : > { %2925 = vpow2.f32 %v1975_v15  ;;  %v2378_v20 = vsel %vm2364_vm6, %v2274_v0, 0.0  ;;  %vm1820_vm0 = vcmp.eq.s32.totalorder %v1768_v63, 1 }
 0x2af   : > { %v3894_v2 = vpop.f32.mrf.mxu2  ;;  %v2379_v8 = vadd.f32 %v2378_v20, %v2377_v55  ;;  %v2346_v62 = vsel %vm1842_vm11, %v2771_v58, 0.0  ;;  %v2924_v37 = vpop.eup %2923  ;;  %2927 = vlog2.f32 %v2084_v4  ;;  %v2088_v16 = vadd.f32 1.0, %v2087_v21  ;;  %vm1844_vm10 = vmand %vm1820_vm0, %vm1700_vm7 }
 0x2b0   : > { %v1918_v40 = vand.u32 2147483647, %v3894_v2  ;;  %v2435_v24 = vsel %vm2364_vm6, %v2346_v62, 0.0  ;;  %v2077_v29 = vmul.f32 0.6931472, %v2924_v37  ;;  %v1893_v58 = vmax.f32 %v1869_v14, 0.0  ;;  %vm1701_vm11 = vmxor %vm1653_vm8, %vm3097_vm15 }
 0x2b1   : > { %v2436_v18 = vadd.f32 %v2435_v24, %v2434_v5  ;;  %v2090_v55 = vand.u32 2147483647, %v2922_v6  ;;  %v1892_v5 = vmax.f32 %v1868_v48, 0.0  ;;  %v2089_v12 = vmul.f32 %v2922_v6, %v2088_v16 }
 0x2b2   : > { %v1942_v47 = vsub.f32 0.0, %v1918_v40  ;;  %v2083_v56 = vsel %vm2082_vm13, %v2080_v26, %v2077_v29 }
 0x2b3   : > { %v2227_v34 = vadd.f32 %v2083_v56, %v1891_v54  ;;  %vm2091_vm3 = vcmp.lt.f32.partialorder %v2090_v55, 0.0004427343 }
 0x2b4   : > { %v2926_v49 = vpop.eup %2925  ;;  %v1977_v17 = vmul.f32 1.442695, %v1942_v47 }
 0x2b5   : > { %v2093_v52 = vadd.f32 1.0, %v2926_v49  ;;  %v2096_v36 = vmul.f32 -0.5, %v2926_v49  ;;  %v2099_v1 = vand.u32 2147483647, %v2926_v49  ;;  %v2928_v11 = vpop.eup %2927  ;;  %v2251_v42 = vsub.f32 0.6931472, %v2227_v34 }
 0x2b6   : > { %2929 = vpow2.f32 %v1977_v17  ;;  %v2299_v27 = vadd.f32 %v2227_v34, %v3835_v31  ;;  %v2086_v9 = vmul.f32 0.6931472, %v2928_v11  ;;  %v1771_v17 = vpop.permute.xlu0 %1770 }
 0x2b7   : > { %v3906_v57 = vpop.f32.mrf.mxu2  ;;  %2931 = vlog2.f32 %v2093_v52  ;;  %v2097_v15 = vadd.f32 1.0, %v2096_v36  ;;  %v2275_v53 = vsel %vm1651_vm12, %v2251_v42, 0.0  ;;  %vm3922_vm5 = vcmp.lt.f32.partialorder %v2099_v1, 0.0004427343 }
 0x2b8   : > { %v1919_v41 = vand.u32 2147483647, %v3906_v57  ;;  %v2772_v0 = vadd.f32 -0.6931472, %v2299_v27  ;;  %v2380_v44 = vsel %vm2364_vm6, %v2275_v53, 0.0  ;;  %v2092_v61 = vsel %vm2091_vm3, %v2089_v12, %v2086_v9 }
 0x2b9   : > { %v2381_v10 = vadd.f32 %v2380_v44, %v2379_v8  ;;  %v2228_v4 = vadd.f32 %v2092_v61, %v1892_v5  ;;  %v2098_v47 = vmul.f32 %v2926_v49, %v2097_v15  ;;  %vm1821_vm9 = vcmp.eq.s32.totalorder %v1771_v17, 1 }
 0x2ba   : > { %v1943_v50 = vsub.f32 0.0, %v1919_v41  ;;  %v2347_v62 = vsel %vm1843_vm4, %v2772_v0, 0.0  ;;  %vm1654_vm12 = vcmp.eq.s32.totalorder %v3666_v30, %v3706_v23  ;;  %vm1845_vm13 = vmand %vm1821_vm9, %vm1701_vm11  ;;  %vm1655_vm4 = vcmp.eq.s32.totalorder %v3664_v25, %v3706_v23 }
 0x2bb   : > { %v2437_v24 = vsel %vm2364_vm6, %v2347_v62, 0.0  ;;  %v2252_v54 = vsub.f32 0.6931472, %v2228_v4  ;;  %v2300_v48 = vadd.f32 %v2228_v4, %v3857_v7  ;;  %v1774_v62 = vpop.permute.xlu1 %1773  ;;  %vm1702_vm1 = vmxor %vm1654_vm12, %vm3097_vm15 }
 0x2bc   : > { %v2930_v20 = vpop.eup %2929  ;;  %v1979_v6 = vmul.f32 1.442695, %v1943_v50  ;;  %v2438_v26 = vadd.f32 %v2437_v24, %v2436_v18  ;;  %v1870_v18 = vsub.f32 0.0, %v3894_v2  ;;  %vm1822_vm2 = vcmp.eq.s32.totalorder %v1774_v62, 1 }
 0x2bd   : > { %v2932_v40 = vpop.eup %2931  ;;  %v2102_v45 = vadd.f32 1.0, %v2930_v20  ;;  %v2105_v37 = vmul.f32 -0.5, %v2930_v20  ;;  %v2276_v49 = vsel %vm1652_vm14, %v2252_v54, 0.0  ;;  %v2773_v52 = vadd.f32 -0.6931472, %v2300_v48  ;;  %vm1846_vm0 = vmand %vm1822_vm2, %vm1702_vm1 }
 0x2be   : > { %v2095_v21 = vmul.f32 0.6931472, %v2932_v40  ;;  %v2382_v7 = vsel %vm2364_vm6, %v2276_v49, 0.0  ;;  %v2108_v36 = vand.u32 2147483647, %v2930_v20  ;;  %v1894_v5 = vmax.f32 %v1870_v18, 0.0 }
 0x2bf   : > { %v3927_v29 = vpop.f32.mrf.mxu2  ;;  %2933 = vlog2.f32 %v2102_v45  ;;  %v2106_v16 = vadd.f32 1.0, %v2105_v37  ;;  %v2348_v34 = vsel %vm1844_vm10, %v2773_v52, 0.0  ;;  %v2383_v59 = vadd.f32 %v2382_v7, %v2381_v10 }
 0x2c0   : > { %v2101_v8 = vsel %vm3922_vm5, %v2098_v47, %v2095_v21  ;;  %2935 = vpow2.f32 %v1979_v6  ;;  %v1920_v33 = vand.u32 2147483647, %v3927_v29  ;;  %v2439_v63 = vsel %vm2364_vm6, %v2348_v34, 0.0  ;;  %vm1703_vm5 = vmxor %vm1655_vm4, %vm3097_vm15 }
 0x2c1   : > { %v2229_v56 = vadd.f32 %v2101_v8, %v1893_v58  ;;  %v2440_v11 = vadd.f32 %v2439_v63, %v2438_v26  ;;  %v2107_v15 = vmul.f32 %v2930_v20, %v2106_v16  ;;  %vm2109_vm14 = vcmp.lt.f32.partialorder %v2108_v36, 0.0004427343 }
 0x2c2   : > { %v1944_v1 = vsub.f32 0.0, %v1920_v33  ;;  %v1871_v37 = vsub.f32 0.0, %v3906_v57  ;;  %vm1656_vm10 = vcmp.eq.s32.totalorder %v3670_v32, %v3706_v23  ;;  %vm1657_vm1 = vcmp.eq.s32.totalorder %v3676_v38, %v3706_v23 }
 0x2c3   : > { %v2253_v55 = vsub.f32 0.6931472, %v2229_v56  ;;  %v2301_v14 = vadd.f32 %v2229_v56, %v3879_v46  ;;  %vm1704_vm11 = vmxor %vm1656_vm10, %vm3097_vm15 }
 0x2c4   : > { %v1981_v50 = vmul.f32 1.442695, %v1944_v1  ;;  %v1895_v33 = vmax.f32 %v1871_v37, 0.0  ;;  %v1777_v1 = vpop.permute.xlu2 %1776  ;;  %vm1705_vm2 = vmxor %vm1657_vm1, %vm3097_vm15 }
 0x2c5   : > { %v2934_v41 = vpop.eup %2933  ;;  %v2277_v42 = vsel %vm1653_vm8, %v2253_v55, 0.0  ;;  %v2774_v27 = vadd.f32 -0.6931472, %v2301_v14  ;;  %vm1823_vm7 = vcmp.eq.s32.totalorder %v1777_v1, 1 }
 0x2c6   : > { %v2936_v9 = vpop.eup %2935  ;;  %v2384_v12 = vsel %vm2364_vm6, %v2277_v42, 0.0  ;;  %v2104_v46 = vmul.f32 0.6931472, %v2934_v41  ;;  %2937 = vpow2.f32 %v1981_v50  ;;  %vm1847_vm8 = vmand %vm1823_vm7, %vm1703_vm5  ;;  %vm1658_vm5 = vcmp.eq.s32.totalorder %v3674_v35, %v3706_v23 }
 0x2c7   : > { %v3958_v53 = vpop.f32.mrf.mxu2  ;;  %v2349_v0 = vsel %vm1845_vm13, %v2774_v27, 0.0  ;;  %v2385_v58 = vadd.f32 %v2384_v12, %v2383_v59  ;;  %v2111_v44 = vadd.f32 1.0, %v2936_v9  ;;  %v2114_v31 = vmul.f32 -0.5, %v2936_v9  ;;  %vm1706_vm7 = vmxor %vm1658_vm5, %vm3097_vm15 }
 0x2c8   : > { %v2441_v61 = vsel %vm2364_vm6, %v2349_v0, 0.0  ;;  %v2110_v28 = vsel %vm2109_vm14, %v2107_v15, %v2104_v46  ;;  %v1921_v10 = vand.u32 2147483647, %v3958_v53  ;;  %v2117_v26 = vand.u32 2147483647, %v2936_v9 }
 0x2c9   : > { %v2442_v6 = vadd.f32 %v2441_v61, %v2440_v11  ;;  %v2230_v40 = vadd.f32 %v2110_v28, %v1894_v5  ;;  %2939 = vlog2.f32 %v2111_v44  ;;  %v2115_v45 = vadd.f32 1.0, %v2114_v31 }
 0x2ca   : > { %v1945_v24 = vsub.f32 0.0, %v1921_v10  ;;  %vm2118_vm3 = vcmp.lt.f32.partialorder %v2117_v26, 0.0004427343  ;;  %v1872_v59 = vsub.f32 0.0, %v3927_v29 }
 0x2cb   : > { %v2254_v20 = vsub.f32 0.6931472, %v2230_v40  ;;  %v2302_v4 = vadd.f32 %v2230_v40, %v3894_v2  ;;  %v2116_v16 = vmul.f32 %v2936_v9, %v2115_v45  ;;  %v1780_v45 = vpop.permute.xlu0 %1779 }
 0x2cc   : > { %v2938_v17 = vpop.eup %2937  ;;  %v1983_v48 = vmul.f32 1.442695, %v1945_v24  ;;  %v1896_v9 = vmax.f32 %v1872_v59, 0.0 }
 0x2cd   : > { %v2278_v21 = vsel %vm1654_vm12, %v2254_v20, 0.0  ;;  %v2775_v47 = vadd.f32 -0.6931472, %v2302_v4  ;;  %v2120_v56 = vadd.f32 1.0, %v2938_v17  ;;  %v2123_v18 = vmul.f32 -0.5, %v2938_v17 }
 0x2ce   : > { %v2386_v54 = vsel %vm2364_vm6, %v2278_v21, 0.0  ;;  %2941 = vpow2.f32 %v1983_v48  ;;  %v2126_v27 = vand.u32 2147483647, %v2938_v17  ;;  %v1873_v20 = vsub.f32 0.0, %v3958_v53 }
 0x2cf   : > { %v3972_v8 = vpop.f32.mrf.mxu2  ;;  %v2940_v49 = vpop.eup %2939  ;;  %v2350_v52 = vsel %vm1846_vm0, %v2775_v47, 0.0  ;;  %v2387_v2 = vadd.f32 %v2386_v54, %v2385_v58  ;;  %2943 = vlog2.f32 %v2120_v56  ;;  %v2124_v63 = vadd.f32 1.0, %v2123_v18 }
 0x2d0   : > { %v2443_v7 = vsel %vm2364_vm6, %v2350_v52, 0.0  ;;  %v2113_v30 = vmul.f32 0.6931472, %v2940_v49  ;;  %v1922_v55 = vand.u32 2147483647, %v3972_v8  ;;  %vm1824_vm12 = vcmp.eq.s32.totalorder %v1780_v45, 1 }
 0x2d1   : > { %v2444_v36 = vadd.f32 %v2443_v7, %v2442_v6  ;;  %v2125_v58 = vmul.f32 %v2938_v17, %v2124_v63  ;;  %vm2127_vm9 = vcmp.lt.f32.partialorder %v2126_v27, 0.0004427343  ;;  %vm1848_vm13 = vmand %vm1824_vm12, %vm1704_vm11  ;;  %v1783_v63 = vpop.permute.xlu1 %1782  ;;  %vm1660_vm12 = vcmp.eq.s32.totalorder %v3687_v39, %v3706_v23 }
 0x2d2   : > { %v2119_v34 = vsel %vm2118_vm3, %v2116_v16, %v2113_v30  ;;  %v1946_v41 = vsub.f32 0.0, %v1922_v55  ;;  %vm1825_vm0 = vcmp.eq.s32.totalorder %v1783_v63, 1 }
 0x2d3   : > { %v2231_v14 = vadd.f32 %v2119_v34, %v1895_v33  ;;  %vm1849_vm3 = vmand %vm1825_vm0, %vm1705_vm2 }
 0x2d4   : > { %v2942_v5 = vpop.eup %2941  ;;  %v1985_v12 = vmul.f32 1.442695, %v1946_v41 }
 0x2d5   : > { %v2255_v11 = vsub.f32 0.6931472, %v2231_v14  ;;  %v2303_v42 = vadd.f32 %v2231_v14, %v3906_v57  ;;  %v2944_v15 = vpop.eup %2943  ;;  %v2129_v44 = vadd.f32 1.0, %v2942_v5  ;;  %v2132_v31 = vmul.f32 -0.5, %v2942_v5 }
 0x2d6   : > { %v2122_v28 = vmul.f32 0.6931472, %v2944_v15  ;;  %2945 = vpow2.f32 %v1985_v12  ;;  %v2135_v37 = vand.u32 2147483647, %v2942_v5  ;;  %v1874_v14 = vsub.f32 0.0, %v3972_v8 }
 0x2d7   : > { %v3984_v46 = vpop.f32.mrf.mxu2  ;;  %v2279_v50 = vsel %vm1655_vm4, %v2255_v11, 0.0  ;;  %v2776_v0 = vadd.f32 -0.6931472, %v2303_v42  ;;  %2947 = vlog2.f32 %v2129_v44  ;;  %v2133_v24 = vadd.f32 1.0, %v2132_v31 }
 0x2d8   : > { %v2388_v61 = vsel %vm2364_vm6, %v2279_v50, 0.0  ;;  %v2128_v25 = vsel %vm2127_vm9, %v2125_v58, %v2122_v28  ;;  %v1923_v4 = vand.u32 2147483647, %v3984_v46  ;;  %vm2136_vm14 = vcmp.lt.f32.partialorder %v2135_v37, 0.0004427343 }
 0x2d9   : > { %v2351_v57 = vsel %vm1847_vm8, %v2776_v0, 0.0  ;;  %v2389_v6 = vadd.f32 %v2388_v61, %v2387_v2  ;;  %v2232_v10 = vadd.f32 %v2128_v25, %v1896_v9  ;;  %v1897_v2 = vmax.f32 %v1873_v20, 0.0 }
 0x2da   : > { %v2445_v40 = vsel %vm2364_vm6, %v2351_v57, 0.0  ;;  %v1947_v17 = vsub.f32 0.0, %v1923_v4  ;;  %v2134_v30 = vmul.f32 %v2942_v5, %v2133_v24  ;;  %v1898_v0 = vmax.f32 %v1874_v14, 0.0  ;;  %v1786_v4 = vpop.permute.xlu2 %1785 }
 0x2db   : > { %v2446_v62 = vadd.f32 %v2445_v40, %v2444_v36  ;;  %v2256_v21 = vsub.f32 0.6931472, %v2232_v10  ;;  %v2304_v47 = vadd.f32 %v2232_v10, %v3927_v29  ;;  %vm1826_vm8 = vcmp.eq.s32.totalorder %v1786_v4, 1 }
 0x2dc   : > { %v2946_v26 = vpop.eup %2945  ;;  %v1987_v34 = vmul.f32 1.442695, %v1947_v17  ;;  %vm1850_vm9 = vmand %vm1826_vm8, %vm1706_vm7 }
 0x2dd   : > { %v2948_v48 = vpop.eup %2947  ;;  %v2280_v49 = vsel %vm1656_vm10, %v2256_v21, 0.0  ;;  %v2777_v52 = vadd.f32 -0.6931472, %v2304_v47  ;;  %v2138_v56 = vadd.f32 1.0, %v2946_v26  ;;  %v2141_v16 = vmul.f32 -0.5, %v2946_v26 }
 0x2de   : > { %v2390_v18 = vsel %vm2364_vm6, %v2280_v49, 0.0  ;;  %v2131_v7 = vmul.f32 0.6931472, %v2948_v48  ;;  %v2144_v27 = vand.u32 2147483647, %v2946_v26  ;;  %vm1659_vm10 = vcmp.eq.s32.totalorder %v3683_v51, %v3706_v23 }
 0x2df   : > { %v4000_v54 = vpop.f32.mrf.mxu2  ;;  %v2352_v29 = vsel %vm1848_vm13, %v2777_v52, 0.0  ;;  %v2391_v36 = vadd.f32 %v2390_v18, %v2389_v6  ;;  %2949 = vlog2.f32 %v2138_v56  ;;  %v2142_v1 = vadd.f32 1.0, %v2141_v16 }
 0x2e0   : > { %v2447_v33 = vsel %vm2364_vm6, %v2352_v29, 0.0  ;;  %v2137_v32 = vsel %vm2136_vm14, %v2134_v30, %v2131_v7  ;;  %2951 = vpow2.f32 %v1987_v34  ;;  %v1924_v41 = vand.u32 2147483647, %v4000_v54  ;;  %vm1707_vm14 = vmxor %vm1659_vm10, %vm3097_vm15 }
 0x2e1   : > { %v2448_v59 = vadd.f32 %v2447_v33, %v2446_v62  ;;  %v2233_v55 = vadd.f32 %v2137_v32, %v1897_v2  ;;  %v2143_v28 = vmul.f32 %v2946_v26, %v2142_v1  ;;  %vm2145_vm4 = vcmp.lt.f32.partialorder %v2144_v27, 0.0004427343 }
 0x2e2   : > { %v1948_v5 = vsub.f32 0.0, %v1924_v41  ;;  %v1875_v52 = vsub.f32 0.0, %v3984_v46  ;;  %v1876_v63 = vsub.f32 0.0, %v4000_v54 }
 0x2e3   : > { %v2257_v11 = vsub.f32 0.6931472, %v2233_v55  ;;  %v2305_v42 = vadd.f32 %v2233_v55, %v3958_v53 }
 0x2e4   : > { %v1989_v31 = vmul.f32 1.442695, %v1948_v5  ;;  %v1899_v14 = vmax.f32 %v1875_v52, 0.0  ;;  %v1792_v5 = vpop.permute.xlu1 %1791 }
 0x2e5   : > { %v2950_v12 = vpop.eup %2949  ;;  %v2281_v15 = vsel %vm1657_vm1, %v2257_v11, 0.0  ;;  %v2778_v50 = vadd.f32 -0.6931472, %v2305_v42  ;;  %vm1828_vm13 = vcmp.eq.s32.totalorder %v1792_v5, 1 }
 0x2e6   : > { %v2392_v44 = vsel %vm2364_vm6, %v2281_v15, 0.0  ;;  %v2140_v61 = vmul.f32 0.6931472, %v2950_v12  ;;  %v2952_v40 = vpop.eup %2951  ;;  %2953 = vpow2.f32 %v1989_v31 }
 0x2e7   : > { %v4016_v9 = vpop.f32.mrf.mxu2  ;;  %v2353_v53 = vsel %vm1849_vm3, %v2778_v50, 0.0  ;;  %v2393_v57 = vadd.f32 %v2392_v44, %v2391_v36  ;;  %v2147_v20 = vadd.f32 1.0, %v2952_v40  ;;  %v2150_v45 = vmul.f32 -0.5, %v2952_v40 }
 0x2e8   : > { %v1925_v58 = vand.u32 2147483647, %v4016_v9  ;;  %v2449_v38 = vsel %vm2364_vm6, %v2353_v53, 0.0  ;;  %v2146_v25 = vsel %vm2145_vm4, %v2143_v28, %v2140_v61  ;;  %v2153_v7 = vand.u32 2147483647, %v2952_v40  ;;  %vm1708_vm4 = vmxor %vm1660_vm12, %vm3097_vm15 }
 0x2e9   : > { %v2450_v62 = vadd.f32 %v2449_v38, %v2448_v59  ;;  %v2234_v10 = vadd.f32 %v2146_v25, %v1898_v0  ;;  %2955 = vlog2.f32 %v2147_v20  ;;  %v2151_v2 = vadd.f32 1.0, %v2150_v45  ;;  %v1789_v0 = vpop.permute.xlu0 %1788  ;;  %vm1852_vm8 = vmand %vm1828_vm13, %vm1708_vm4 }
 0x2ea   : > { %v1949_v6 = vsub.f32 0.0, %v1925_v58  ;;  %vm2154_vm11 = vcmp.lt.f32.partialorder %v2153_v7, 0.0004427343  ;;  %v1877_v50 = vsub.f32 0.0, %v4016_v9  ;;  %vm1827_vm1 = vcmp.eq.s32.totalorder %v1789_v0, 1 }
 0x2eb   : > { %v2258_v21 = vsub.f32 0.6931472, %v2234_v10  ;;  %v2306_v47 = vadd.f32 %v2234_v10, %v3972_v8  ;;  %v2152_v59 = vmul.f32 %v2952_v40, %v2151_v2  ;;  %v1900_v53 = vmax.f32 %v1876_v63, 0.0  ;;  %vm1851_vm0 = vmand %vm1827_vm1, %vm1707_vm14 }
 0x2ec   : > { %v1991_v24 = vmul.f32 1.442695, %v1949_v6  ;;  %v2954_v48 = vpop.eup %2953  ;;  %v1901_v10 = vmax.f32 %v1877_v50, 0.0 }
 0x2ed   : > { %v2282_v26 = vsel %vm1658_vm5, %v2258_v21, 0.0  ;;  %v2779_v17 = vadd.f32 -0.6931472, %v2306_v47  ;;  %v2156_v30 = vadd.f32 1.0, %v2954_v48  ;;  %v2159_v29 = vmul.f32 -0.5, %v2954_v48 }
 0x2ee   : > { %2957 = vpow2.f32 %v1991_v24  ;;  %v2394_v49 = vsel %vm2364_vm6, %v2282_v26, 0.0  ;;  %v2162_v15 = vand.u32 2147483647, %v2954_v48  ;;  %vm1661_vm5 = vcmp.eq.s32.totalorder %v3685_v13, %v3706_v23 }
 0x2ef   : > { %v4031_v37 = vpop.f32.mrf.mxu2  ;;  %v2354_v18 = vsel %vm1850_vm9, %v2779_v17, 0.0  ;;  %v2395_v8 = vadd.f32 %v2394_v49, %v2393_v57  ;;  %v2956_v35 = vpop.eup %2955  ;;  %2959 = vlog2.f32 %v2156_v30  ;;  %v2160_v11 = vadd.f32 1.0, %v2159_v29  ;;  %vm1709_vm9 = vmxor %vm1661_vm5, %vm3097_vm15 }
 0x2f0   : > { %v1926_v56 = vand.u32 2147483647, %v4031_v37  ;;  %v2451_v16 = vsel %vm2364_vm6, %v2354_v18, 0.0  ;;  %v2149_v34 = vmul.f32 0.6931472, %v2956_v35  ;;  %v1795_v18 = vpop.permute.xlu2 %1794 }
 0x2f1   : > { %v2452_v33 = vadd.f32 %v2451_v16, %v2450_v62  ;;  %v2161_v6 = vmul.f32 %v2954_v48, %v2160_v11  ;;  %vm2163_vm2 = vcmp.lt.f32.partialorder %v2162_v15, 0.0004427343  ;;  %vm1829_vm7 = vcmp.eq.s32.totalorder %v1795_v18, 1 }
 0x2f2   : > { %v1950_v36 = vsub.f32 0.0, %v1926_v56  ;;  %v2155_v41 = vsel %vm2154_vm11, %v2152_v59, %v2149_v34  ;;  %vm1853_vm11 = vmand %vm1829_vm7, %vm1709_vm9 }
 0x2f3   : > { %v2235_v12 = vadd.f32 %v2155_v41, %v1899_v14 }
 0x2f4   : > { %v2958_v32 = vpop.eup %2957  ;;  %v1993_v55 = vmul.f32 1.442695, %v1950_v36 }
 0x2f5   : > { %v2165_v1 = vadd.f32 1.0, %v2958_v32  ;;  %v2168_v42 = vmul.f32 -0.5, %v2958_v32  ;;  %v2171_v58 = vand.u32 2147483647, %v2958_v32  ;;  %v2960_v61 = vpop.eup %2959  ;;  %v2259_v28 = vsub.f32 0.6931472, %v2235_v12 }
 0x2f6   : > { %2961 = vpow2.f32 %v1993_v55  ;;  %v2307_v31 = vadd.f32 %v2235_v12, %v3984_v46  ;;  %v2158_v57 = vmul.f32 0.6931472, %v2960_v61 }
 0x2f7   : > { %v4043_v27 = vpop.f32.mrf.mxu2  ;;  %2963 = vlog2.f32 %v2165_v1  ;;  %v2169_v40 = vadd.f32 1.0, %v2168_v42  ;;  %v2283_v25 = vsel %vm1659_vm10, %v2259_v28, 0.0  ;;  %vm4058_vm3 = vcmp.lt.f32.partialorder %v2171_v58, 0.0004427343 }
 0x2f8   : > { %v1927_v44 = vand.u32 2147483647, %v4043_v27  ;;  %v2780_v62 = vadd.f32 -0.6931472, %v2307_v31  ;;  %v2396_v4 = vsel %vm2364_vm6, %v2283_v25, 0.0  ;;  %v2164_v45 = vsel %vm2163_vm2, %v2161_v6, %v2158_v57  ;;  %v1798_v25 = vpop.permute.xlu0 %1797 }
 0x2f9   : > { %v2397_v26 = vadd.f32 %v2396_v4, %v2395_v8  ;;  %v2236_v17 = vadd.f32 %v2164_v45, %v1900_v53  ;;  %v2170_v52 = vmul.f32 %v2958_v32, %v2169_v40  ;;  %vm1662_vm10 = vcmp.eq.s32.totalorder %v3695_v3, %v3706_v23 }
 0x2fa   : > { %v1951_v38 = vsub.f32 0.0, %v1927_v44  ;;  %v2355_v47 = vsel %vm1851_vm0, %v2780_v62, 0.0  ;;  %vm1710_vm13 = vmxor %vm1662_vm10, %vm3097_vm15  ;;  %vm1830_vm14 = vcmp.eq.s32.totalorder %v1798_v25, 1  ;;  %vm1663_vm0 = vcmp.eq.s32.totalorder %v3700_v19, %v3706_v23 }
 0x2fb   : > { %v2453_v51 = vsel %vm2364_vm6, %v2355_v47, 0.0  ;;  %v2260_v30 = vsub.f32 0.6931472, %v2236_v17  ;;  %v2308_v16 = vadd.f32 %v2236_v17, %v4000_v54  ;;  %vm1854_vm1 = vmand %vm1830_vm14, %vm1710_vm13 }
 0x2fc   : > { %v2962_v20 = vpop.eup %2961  ;;  %v1995_v46 = vmul.f32 1.442695, %v1951_v38  ;;  %v2454_v7 = vadd.f32 %v2453_v51, %v2452_v33  ;;  %v1878_v33 = vsub.f32 0.0, %v4031_v37 }
 0x2fd   : > { %v2964_v21 = vpop.eup %2963  ;;  %v2174_v48 = vadd.f32 1.0, %v2962_v20  ;;  %v2177_v2 = vmul.f32 -0.5, %v2962_v20  ;;  %v2284_v29 = vsel %vm1660_vm12, %v2260_v30, 0.0  ;;  %v2781_v36 = vadd.f32 -0.6931472, %v2308_v16 }
 0x2fe   : > { %v2167_v49 = vmul.f32 0.6931472, %v2964_v21  ;;  %v2398_v54 = vsel %vm2364_vm6, %v2284_v29, 0.0  ;;  %v2180_v34 = vand.u32 2147483647, %v2962_v20  ;;  %v1902_v15 = vmax.f32 %v1878_v33, 0.0 }
 0x2ff   : > { %v4063_v56 = vpop.f32.mrf.mxu2  ;;  %2965 = vlog2.f32 %v2174_v48  ;;  %v2178_v32 = vadd.f32 1.0, %v2177_v2  ;;  %v2356_v55 = vsel %vm1852_vm8, %v2781_v36, 0.0  ;;  %v2399_v39 = vadd.f32 %v2398_v54, %v2397_v26  ;;  %v1801_v54 = vpop.permute.xlu1 %1800 }
 0x300   : > { %v2173_v8 = vsel %vm4058_vm3, %v2170_v52, %v2167_v49  ;;  %2967 = vpow2.f32 %v1995_v46  ;;  %v1928_v59 = vand.u32 2147483647, %v4063_v56  ;;  %v2455_v1 = vsel %vm2364_vm6, %v2356_v55, 0.0  ;;  %vm1711_vm3 = vmxor %vm1663_vm0, %vm3097_vm15 }
 0x301   : > { %v2237_v35 = vadd.f32 %v2173_v8, %v1901_v10  ;;  %v2456_v42 = vadd.f32 %v2455_v1, %v2454_v7  ;;  %v2179_v58 = vmul.f32 %v2962_v20, %v2178_v32  ;;  %vm2181_vm12 = vcmp.lt.f32.partialorder %v2180_v34, 0.0004427343 }
 0x302   : > { %v1952_v41 = vsub.f32 0.0, %v1928_v59  ;;  %v1879_v21 = vsub.f32 0.0, %v4043_v27  ;;  %vm1831_vm4 = vcmp.eq.s32.totalorder %v1801_v54, 1  ;;  %vm618_vm8 = vcmask 32768  }
 0x303   : > { %v2261_v14 = vsub.f32 0.6931472, %v2237_v35  ;;  %v2309_v63 = vadd.f32 %v2237_v35, %v4016_v9 }
 0x304   : > { %v1997_v44 = vmul.f32 1.442695, %v1952_v41  ;;  %v1903_v8 = vmax.f32 %v1879_v21, 0.0 }
 0x305   : > { %v2966_v11 = vpop.eup %2965  ;;  %v2285_v5 = vsel %vm1661_vm5, %v2261_v14, 0.0  ;;  %v2782_v12 = vadd.f32 -0.6931472, %v2309_v63  ;;  %v1880_v14 = vsub.f32 0.0, %v4063_v56  ;;  %vm1855_vm5 = vmand %vm1831_vm4, %vm1711_vm3  ;;  %vm1666_vm3 = vcmp.eq.s32.totalorder %v3714_v60, %v3706_v23 }
 0x306   : > { %v2968_v50 = vpop.eup %2967  ;;  %v2400_v0 = vsel %vm2364_vm6, %v2285_v5, 0.0  ;;  %v2176_v9 = vmul.f32 0.6931472, %v2966_v11  ;;  %2969 = vpow2.f32 %v1997_v44 }
 0x307   : > { %v4094_v61 = vpop.f32.mrf.mxu2  ;;  %v2357_v28 = vsel %vm1853_vm11, %v2782_v12, 0.0  ;;  %v2401_v31 = vadd.f32 %v2400_v0, %v2399_v39  ;;  %v2183_v53 = vadd.f32 1.0, %v2968_v50  ;;  %v2186_v6 = vmul.f32 -0.5, %v2968_v50 }
 0x308   : > { %v2457_v57 = vsel %vm2364_vm6, %v2357_v28, 0.0  ;;  %v2182_v13 = vsel %vm2181_vm12, %v2179_v58, %v2176_v9  ;;  %v1929_v62 = vand.u32 2147483647, %v4094_v61  ;;  %v2189_v47 = vand.u32 2147483647, %v2968_v50 }
 0x309   : > { %v2458_v40 = vadd.f32 %v2457_v57, %v2456_v42  ;;  %v2238_v38 = vadd.f32 %v2182_v13, %v1902_v15  ;;  %2971 = vlog2.f32 %v2183_v53  ;;  %v2187_v4 = vadd.f32 1.0, %v2186_v6 }
 0x30a   : > { %v1953_v45 = vsub.f32 0.0, %v1929_v62  ;;  %vm2190_vm2 = vcmp.lt.f32.partialorder %v2189_v47, 0.0004427343  ;;  %v1904_v44 = vmax.f32 %v1880_v14, 0.0  ;;  %v1881_v53 = vsub.f32 0.0, %v4094_v61  ;;  %v1807_v47 = vpop.permute.xlu0 %1806 }
 0x30b   : > { %v2262_v10 = vsub.f32 0.6931472, %v2238_v38  ;;  %v2310_v20 = vadd.f32 %v2238_v38, %v4031_v37  ;;  %v2188_v30 = vmul.f32 %v2968_v50, %v2187_v4  ;;  %v3098_v13 = vmov 0.0  }
 0x30c   : > { %v2970_v26 = vpop.eup %2969  ;;  %v1999_v48 = vmul.f32 1.442695, %v1953_v45  ;;  %619 = vst.msk [vmem:[%s4134_s30] sm:$0x1] %vm618_vm8, %v3098_v13  ;;  %v1905_v45 = vmax.f32 %v1881_v53, 0.0  ;;  %vm1665_vm11 = vcmp.eq.s32.totalorder %v3712_v43, %v3706_v23 }
 0x30d   : > { %v2286_v24 = vsel %vm1662_vm10, %v2262_v10, 0.0  ;;  %v2783_v46 = vadd.f32 -0.6931472, %v2310_v20  ;;  %v2192_v2 = vadd.f32 1.0, %v2970_v26  ;;  %v2195_v37 = vmul.f32 -0.5, %v2970_v26  ;;  %v1804_v20 = vpop.permute.xlu2 %1803  ;;  %vm1713_vm14 = vmxor %vm1665_vm11, %vm3097_vm15 }
 0x30e   : > { %v2402_v17 = vsel %vm2364_vm6, %v2286_v24, 0.0  ;;  %2973 = vpow2.f32 %v1999_v48  ;;  %v2198_v55 = vand.u32 2147483647, %v2970_v26  ;;  %620 = vst.msk [vmem:[%s4139_s23] sm:$0x1] %vm618_vm8, %v3098_v13  ;;  %vm1664_vm10 = vcmp.eq.s32.totalorder %v3698_v22, %v3706_v23 }
 0x30f   : > { %v2972_v51 = vpop.eup %2971  ;;  %v2358_v49 = vsel %vm1854_vm1, %v2783_v46, 0.0  ;;  %v2403_v52 = vadd.f32 %v2402_v17, %v2401_v31  ;;  %v4108_v18 = vpop.f32.mrf.mxu2  ;;  %2975 = vlog2.f32 %v2192_v2  ;;  %v2196_v33 = vadd.f32 1.0, %v2195_v37  ;;  %vm1712_vm13 = vmxor %vm1664_vm10, %vm3097_vm15 }
 0x310   : > { %v2459_v7 = vsel %vm2364_vm6, %v2358_v49, 0.0  ;;  %v2185_v3 = vmul.f32 0.6931472, %v2972_v51  ;;  %v1930_v36 = vand.u32 2147483647, %v4108_v18  ;;  %vm1832_vm12 = vcmp.eq.s32.totalorder %v1804_v20, 1 }
 0x311   : > { %v2460_v16 = vadd.f32 %v2459_v7, %v2458_v40  ;;  %v2197_v42 = vmul.f32 %v2970_v26, %v2196_v33  ;;  %vm2199_vm7 = vcmp.lt.f32.partialorder %v2198_v55, 0.0004427343  ;;  %v1882_v26 = vsub.f32 0.0, %v4108_v18 }
 0x312   : > { %v2191_v29 = vsel %vm2190_vm2, %v2188_v30, %v2185_v3  ;;  %v1954_v32 = vsub.f32 0.0, %v1930_v36  ;;  %vm1833_vm1 = vcmp.eq.s32.totalorder %v1807_v47, 1  ;;  %vm1856_vm2 = vmand %vm1832_vm12, %vm1712_vm13 }
 0x313   : > { %v2239_v35 = vadd.f32 %v2191_v29, %v1903_v8  ;;  %v1810_v8 = vpop.permute.xlu1 %1809  ;;  %vm1857_vm4 = vmand %vm1833_vm1, %vm1713_vm14 }
 0x314   : > { %v2974_v39 = vpop.eup %2973  ;;  %v2001_v63 = vmul.f32 1.442695, %v1954_v32 }
 0x315   : > { %v2263_v34 = vsub.f32 0.6931472, %v2239_v35  ;;  %v2311_v59 = vadd.f32 %v2239_v35, %v4043_v27  ;;  %v2976_v1 = vpop.eup %2975  ;;  %v2201_v5 = vadd.f32 1.0, %v2974_v39  ;;  %v2204_v27 = vmul.f32 -0.5, %v2974_v39 }
 0x316   : > { %v2194_v15 = vmul.f32 0.6931472, %v2976_v1  ;;  %2977 = vpow2.f32 %v2001_v63  ;;  %v2207_v57 = vand.u32 2147483647, %v2974_v39 }
 0x317   : > { %v2287_v41 = vsel %vm1663_vm0, %v2263_v34, 0.0  ;;  %v2784_v11 = vadd.f32 -0.6931472, %v2311_v59  ;;  %2979 = vlog2.f32 %v2201_v5  ;;  %v2205_v28 = vadd.f32 1.0, %v2204_v27 }
 0x318   : > { %v2404_v12 = vsel %vm2364_vm6, %v2287_v41, 0.0  ;;  %v2200_v9 = vsel %vm2199_vm7, %v2197_v42, %v2194_v15  ;;  %vm2208_vm9 = vcmp.lt.f32.partialorder %v2207_v57, 0.0004427343  ;;  %vm1834_vm7 = vcmp.eq.s32.totalorder %v1810_v8, 1 }
 0x319   : > { %v2359_v50 = vsel %vm1855_vm5, %v2784_v11, 0.0  ;;  %v4127_v0 = vadd.f32 %v2404_v12, %v2403_v52  ;;  %v2240_v31 = vadd.f32 %v2200_v9, %v1904_v44  ;;  %v2206_v62 = vmul.f32 %v2974_v39, %v2205_v28  ;;  %vm1714_vm5 = vmxor %vm1666_vm3, %vm3097_vm15 }
 0x31a   : > { %v2461_v19 = vsel %vm2364_vm6, %v2359_v50, 0.0 }
 0x31b   : > { %v4130_v58 = vadd.f32 %v2461_v19, %v2460_v16  ;;  %v2312_v4 = vadd.f32 %v2240_v31, %v4063_v56  ;;  %v2264_v46 = vsub.f32 0.6931472, %v2240_v31  ;;  %v1906_v16 = vmax.f32 %v1882_v26, 0.0  ;;  %v2421_v31 = vld [vmem:[%s4139_s23] sm:$0x1] }
 0x31c   : > { %v2978_v6 = vpop.eup %2977 }
 0x31d   : > { %v2980_v40 = vpop.eup %2979  ;;  %v2210_v38 = vadd.f32 1.0, %v2978_v6  ;;  %v2213_v10 = vmul.f32 -0.5, %v2978_v6  ;;  %v2785_v56 = vadd.f32 -0.6931472, %v2312_v4  ;;  %v2216_v49 = vand.u32 2147483647, %v2978_v6 }
 0x31e   : > { %v2203_v25 = vmul.f32 0.6931472, %v2980_v40  ;;  %v2288_v2 = vsel %vm1664_vm10, %v2264_v46, 0.0 }
 0x31f   : > { %2981 = vlog2.f32 %v2210_v38  ;;  %v2214_v17 = vadd.f32 1.0, %v2213_v10  ;;  %v2360_v30 = vsel %vm1856_vm2, %v2785_v56, 0.0  ;;  %vm2217_vm0 = vcmp.lt.f32.partialorder %v2216_v49, 0.0004427343 }
 0x320   : > { %v2209_v24 = vsel %vm2208_vm9, %v2206_v62, %v2203_v25  ;;  %v2406_v29 = vsel %vm2364_vm6, %v2288_v2, 0.0  ;;  %v2463_v33 = vsel %vm2364_vm6, %v2360_v30, 0.0  ;;  %vm1858_vm9 = vmand %vm1834_vm7, %vm1714_vm5 }
 0x321   : > { %v2241_v21 = vadd.f32 %v2209_v24, %v1905_v45  ;;  %v2215_v3 = vmul.f32 %v2978_v6, %v2214_v17  ;;  %v2407_v43 = vadd.f32 %v2406_v29, %v4127_v0  ;;  %v2464_v55 = vadd.f32 %v2463_v33, %v4130_v58  ;;  %v2363_v58 = vld [vmem:[%s4134_s30] sm:$0x1] }
 0x323   : > { %v2265_v48 = vsub.f32 0.6931472, %v2241_v21  ;;  %v2313_v51 = vadd.f32 %v2241_v21, %v4094_v61 }
 0x325   : > { %v2982_v52 = vpop.eup %2981  ;;  %v2786_v37 = vadd.f32 -0.6931472, %v2313_v51  ;;  %v2289_v61 = vsel %vm1665_vm11, %v2265_v48, 0.0 }
 0x326   : > { %v2212_v7 = vmul.f32 0.6931472, %v2982_v52  ;;  %v2408_v54 = vsel %vm2364_vm6, %v2289_v61, 0.0 }
 0x327   : > { %v2361_v36 = vsel %vm1857_vm4, %v2786_v37, 0.0  ;;  %v2409_v39 = vadd.f32 %v2408_v54, %v2407_v43 }
 0x328   : > { %v2218_v22 = vsel %vm2217_vm0, %v2215_v3, %v2212_v7  ;;  %v2465_v59 = vsel %vm2364_vm6, %v2361_v36, 0.0 }
 0x329   : > { %v2242_v35 = vadd.f32 %v2218_v22, %v1906_v16  ;;  %v2466_v41 = vadd.f32 %v2465_v59, %v2464_v55 }
 0x32b   : > { %v2266_v32 = vsub.f32 0.6931472, %v2242_v35  ;;  %v2314_v34 = vadd.f32 %v2242_v35, %v4108_v18 }
 0x32d   : > { %v2290_v14 = vsel %vm1666_vm3, %v2266_v32, 0.0  ;;  %v2787_v63 = vadd.f32 -0.6931472, %v2314_v34 }
 0x32e   : > { %v2410_v1 = vsel %vm2364_vm6, %v2290_v14, 0.0 }
 0x32f   : > { %v2362_v11 = vsel %vm1858_vm9, %v2787_v63, 0.0  ;;  %v2411_v18 = vadd.f32 %v2410_v1, %v2409_v39 }
 0x330   : > { %v2467_v42 = vsel %vm2364_vm6, %v2362_v11, 0.0 }
 0x331   : > { %v2412_v5 = vrot.slane %v2411_v18, 4  ;;  %v2468_v12 = vadd.f32 %v2467_v42, %v2466_v41 }
 0x333   : > { %v2413_v15 = vadd.f32 %v2412_v5, %v2411_v18  ;;  %v2469_v23 = vrot.slane %v2468_v12, 4 }
 0x335   : > { %v2414_v60 = vrot.slane %v2413_v15, 2  ;;  %v2470_v27 = vadd.f32 %v2469_v23, %v2468_v12 }
 0x337   : > { %v2415_v50 = vadd.f32 %v2414_v60, %v2413_v15  ;;  %v2471_v0 = vrot.slane %v2470_v27, 2 }
 0x339   : > { %v2472_v19 = vadd.f32 %v2471_v0, %v2470_v27  ;;  %v2416_v9 = vrot.slane %v2415_v50, 1 }
 0x33b   : > { %v2473_v44 = vrot.slane %v2472_v19, 1  ;;  %v2417_v28 = vadd.f32 %v2416_v9, %v2415_v50 }
 0x33d   : > { %v2474_v53 = vadd.f32 %v2473_v44, %v2472_v19  ;;  %v2418_v57 = vadd.f32 %v2417_v28, %v2363_v58 }
 0x33f   : > { %2420 = vst.msk [vmem:[%s4134_s30] sm:$0x1] %vm618_vm8, %v2418_v57  ;;  %v2475_v13 = vadd.f32 %v2474_v53, %v2421_v31 }
 0x340   : > { %3010 = shalt.err (!%p3007_p7)
}
 0x341   : > { %2814 = dma.vmem_to_hbm [thread:$0]  (%p3224_p4), %s2493_s25, 16, %s2495_s19, %s2478_s24   ;;  %2476 = vst.msk [vmem:[%s4139_s23] sm:$0x1] %vm618_vm8, %v2475_v13 }
 0x342   : > { %s2482_s30 = scalar_lea.sflag [#allocation6], %s4124_s9  ;;  %s3025_s29 = sshra.s32 %s2508_s20, 4  ;;  %s3026_s29 = int_to_ptr.hbm [resolvable:$true] %s3025_s29 }
 0x343   : > { %s3027_s28 = scalar_lea.hbm %s3026_s29, 1  ;;  %s3031_s27 = scalar_lea.hbm %s4271_s16, 2 }
 0x344   : > { %p3028_p9 = scmp.ne.s32.totalorder %s3026_s29, %s3027_s28  ;;  %p3032_p12 = scmp.lt.s32.totalorder %s3026_s29, %s4271_s16 }
 0x345   : > { %p3033_p13 = scmp.lt.s32.totalorder %s3031_s27, %s3027_s28 }
 0x346   : > { %p3029_p10 = pnand %p3028_p9, %p3224_p4 }
 0x347   : > { %p3034_p0 = por %p3033_p13, %p3032_p12 }
 0x348   : > { %p3030_p11 = pneg %p3029_p10 }
 0x34a   : > { %p3035_p1 = pnand %p3034_p0, %p3030_p11 }
 0x34c   : > { %3038 = shalt.err (!%p3035_p1)
}
 0x34d   : > { %2815 = dma.vmem_to_hbm [thread:$0]  (%p3224_p4), %s4201_s1, 16, %s2508_s20, %s2482_s30  }
 0x34e PF: > { %s4313_s9 = sld [smem:[#allocation9_spill]]  ;;  %p2825_p2 = scmp.ge.s32.totalorder %s3093_s26, 2 }
 0x350   : > { %p2819_p3 = pnand %p2825_p2, %p3231_p8 }
 0x352   : > { %p2820_p5 = pneg %p2819_p3 }
 0x354   : > { %s2519_s23 = sand.u32 1, %s4313_s9  }
 0x355   : > { %s2520_s25 = scalar_lea.sflag [#allocation4], %s2519_s23 }
 0x356   : > { %3064 = dma.done.wait (%p2820_p5), %s2520_s25, 16  }
 0x357   : > { %3066 = vsyncadd (%p2820_p5), %s2520_s25, 4294967280  ;;  %s2529_s19 = scalar_lea.sflag [#allocation6], %s2519_s23 }
 0x358   : > { %3068 = dma.done.wait (%p2820_p5), %s2529_s19, 16  }
 0x359   : > { %3070 = vsyncadd (%p2820_p5), %s2529_s19, 4294967280  ;;  %s33_s26 = sadd.s32 1, %s3093_s26   ;;  %s4314_s1 = sld [smem:[#allocation10_spill]] }
 0x35a   : > { %p30_p6 = scmp.ge.s32.totalorder %s33_s26, 4   ;;  %s4315_s23 = sld [smem:[#allocation13_spill]] }
 0x35b   : > { %s4316_s24 = sld [smem:[#allocation11_spill]]  ;;  %s4318_s21 = smov %s3077_s22 }
 0x35c   : > { %s4317_s25 = sld [smem:[#allocation12_spill]]  ;;  %32 = sbr.rel (!%p30_p6) target bundleno = 12 (0xc), region = 139 }
 0x35f   : > { %s4319_s22 = smov %s4314_s1 }
 0x361   :  { %2534 = vsyncpa [#allocation4], 1 }
 0x362   :  { %2536 = vsyncpa [#allocation4 + $0x1], 1 }
 0x363   :  { %2537 = vsyncpa [#allocation6], 1 }
 0x364   :  { %2539 = vsyncpa [#allocation6 + $0x1], 1 }

</bundles_post_ra>
